<compile_context>
chip_gen: v7x
topology: tpu7x:2x2x1
jax: 0.10.0
libtpu: 0.0.40
codegen_flags: <defaults>
</compile_context>

<pallas_src>
import jax
import jax.numpy as jnp
from jax.experimental import pallas as pl
from jax.experimental.pallas import tpu as pltpu

# Model hyper-parameters (matching the nn.Module __init__).
MAX_TOKENS = 100
VOCAB_PAD = 128          # MAX_TOKENS padded up to the 128-lane / MXU width
EMBED_DIM = 16           # embedding_dim
HIDDEN = 32              # both LSTM layers have hidden size 32
GATES = 4 * HIDDEN       # 128 (i, f, g, o)
NUM_CLASSES = 3
SEQ_LEN = 8              # input_length
BATCH = 2

# Row offsets inside the packed weight slab (all 8-sublane aligned).
_R_EMBPROJ = 0                        # rows [  0,128): emb_table @ Wih1^T + b1 (zero-padded)
_R_WHH1 = VOCAB_PAD                   # rows [128,160): Whh1^T
_R_WIH2 = _R_WHH1 + HIDDEN            # rows [160,192): Wih2^T
_R_WHH2 = _R_WIH2 + HIDDEN            # rows [192,224): Whh2^T
_R_WFC = _R_WHH2 + HIDDEN             # rows [224,256): Wfc^T zero-padded to 128 lanes
_R_BIAS = _R_WFC + HIDDEN             # rows [256,264): row 0 = b2, row 1 = bfc (padded)
SLAB_ROWS = _R_BIAS + 8               # 264


def _lstm_fc_kernel(tok_ref,   # (T*B, 1)        int32, time-major token ids
                    w_ref,     # (SLAB_ROWS, 4H) f32,   packed weight/bias slab
                    out_ref,   # (B, 4H)         f32,   lane-dense padded logits
                    g1_ref):   # (T*B, 4H)       f32,   VMEM scratch for layer-1 input gates
    H = HIDDEN
    B = out_ref.shape[0]
    TB = tok_ref.shape[0]
    T = TB // B

    # ---- one-time weight / bias loads (off the recurrence) -----------------
    whh1 = w_ref[_R_WHH1:_R_WHH1 + H, :]          # (H, 4H)
    wih2 = w_ref[_R_WIH2:_R_WIH2 + H, :]          # (H, 4H)
    whh2 = w_ref[_R_WHH2:_R_WHH2 + H, :]          # (H, 4H)
    wfc = w_ref[_R_WFC:_R_WFC + H, :]             # (H, 4H) lanes 0:3 valid, rest zero
    bias = w_ref[_R_BIAS:_R_BIAS + 8, :]          # (8, 4H)
    b2 = jnp.broadcast_to(bias[0:1, :], (B, GATES))   # hoisted broadcast
    bfc = bias[1:2, :]                                 # (1, 4H) zero-padded

    # ---- fused embedding gather + layer-1 input projection (one MXU push) --
    # one_hot(tokens) @ (E @ Wih1^T + b1): exact row selection (0/1 weights),
    # all T*B rows at once; no dynamic gather, no per-step b1 add.
    tok = tok_ref[...]                                              # (T*B, 1)
    lanes = jax.lax.broadcasted_iota(jnp.int32, (TB, VOCAB_PAD), 1)
    onehot = (lanes == tok).astype(jnp.float32)                     # (T*B, 128)
    g1_ref[...] = jnp.dot(onehot, w_ref[_R_EMBPROJ:_R_EMBPROJ + VOCAB_PAD, :],
                          preferred_element_type=jnp.float32)       # (T*B, 4H)

    def gate_act(gates):
        # Full-vreg EUP passes over (B, 4H), then pick the gate slices.
        # PyTorch LSTM gate order: i, f, g, o.
        sig = jax.nn.sigmoid(gates)
        th = jnp.tanh(gates)
        return sig[:, 0:H], sig[:, H:2 * H], th[:, 2 * H:3 * H], sig[:, 3 * H:]

    # Hidden / cell state kept as loop-carried values (vregs).
    h1 = jnp.zeros((B, H), jnp.float32)
    c1 = jnp.zeros((B, H), jnp.float32)
    h2 = jnp.zeros((B, H), jnp.float32)
    c2 = jnp.zeros((B, H), jnp.float32)

    # T is a compile-time constant -> static, fully-unrolled loop so the LLO
    # scheduler can overlap h2@whh2 of step t with layer-1 work of step t.
    for t in range(T):
        # Layer 1: only the recurrent matmul sits on the serial chain; the
        # input-projection slice is a plain vld from scratch.
        gates1 = g1_ref[t * B:(t + 1) * B, :] + jnp.dot(
            h1, whh1, preferred_element_type=jnp.float32)
        i1, f1, g1, o1 = gate_act(gates1)
        c1 = f1 * c1 + i1 * g1
        h1 = o1 * jnp.tanh(c1)

        # Layer 2: split matmuls (no lane concat); h2@whh2 depends only on
        # h2_{t-1} so it can issue before layer-1 of step t finishes.
        gates2 = (jnp.dot(h1, wih2, preferred_element_type=jnp.float32)
                  + jnp.dot(h2, whh2, preferred_element_type=jnp.float32)
                  + b2)
        i2, f2, g2, o2 = gate_act(gates2)
        c2 = f2 * c2 + i2 * g2
        h2 = o2 * jnp.tanh(c2)

    # FC head on the last-timestep layer-2 hidden state.
    # Lane-dense padded store; the wrapper slices out the 3 real classes.
    out_ref[...] = jnp.dot(h2, wfc, preferred_element_type=jnp.float32) + bfc


def pack_params(params):
    """One-time packing (call OUTSIDE the jitted forward).

    Folds the embedding table, Wih1 and b1 into a single pre-projected table
    and packs all remaining weights/biases into one (264, 128) f32 slab so the
    kernel needs exactly one weight DMA and zero per-call packing ops.
    """
    H = HIDDEN
    emb_proj = jnp.dot(params["emb_table"], params["wih1_t"],
                       preferred_element_type=jnp.float32) + params["b1"]   # (100, 4H)
    emb_proj_pad = jnp.zeros((VOCAB_PAD, GATES), jnp.float32).at[
        :MAX_TOKENS, :].set(emb_proj)
    wfc_pad = jnp.zeros((H, GATES), jnp.float32).at[:, :NUM_CLASSES].set(
        params["wfc_t"])
    bias = jnp.zeros((8, GATES), jnp.float32)
    bias = bias.at[0, :].set(params["b2"][0])
    bias = bias.at[1, :NUM_CLASSES].set(params["bfc"][0])
    w_slab = jnp.concatenate(
        [emb_proj_pad,          # rows [  0, 128)
         params["whh1_t"],      # rows [128, 160)
         params["wih2_t"],      # rows [160, 192)
         params["whh2_t"],      # rows [192, 224)
         wfc_pad,               # rows [224, 256)
         bias],                 # rows [256, 264)
        axis=0)                 # (264, 128)
    assert w_slab.shape == (SLAB_ROWS, GATES)
    return w_slab


@jax.jit
def lstm_distilled_forward(tokens, w_slab):
    B, T = tokens.shape
    # Tiny (64-byte) time-major token column; the heavy gather + projection
    # happens inside the kernel as a single one-hot MXU matmul.
    tok_col = jnp.transpose(tokens).reshape(T * B, 1).astype(jnp.int32)

    out_pad = pl.pallas_call(
        _lstm_fc_kernel,
        out_shape=jax.ShapeDtypeStruct((B, GATES), jnp.float32),
        in_specs=[pl.BlockSpec(memory_space=pltpu.MemorySpace.VMEM),
                  pl.BlockSpec(memory_space=pltpu.MemorySpace.VMEM)],
        out_specs=pl.BlockSpec(memory_space=pltpu.MemorySpace.VMEM),
        scratch_shapes=[pltpu.VMEM((T * B, GATES), jnp.float32)],
    )(tok_col, w_slab)
    return out_pad[:, :NUM_CLASSES]


# ---------------- plain-JAX reference (for correctness check) ----------------
def _lstm_layer_ref(x_bte, wih_t, whh_t, b):
    B = x_bte.shape[0]
    H = whh_t.shape[0]

    def step(carry, x_t):
        h, c = carry
        gates = x_t @ wih_t + h @ whh_t + b
        i_g = jax.nn.sigmoid(gates[:, 0 * H:1 * H])
        f_g = jax.nn.sigmoid(gates[:, 1 * H:2 * H])
        g_g = jnp.tanh(gates[:, 2 * H:3 * H])
        o_g = jax.nn.sigmoid(gates[:, 3 * H:4 * H])
        c = f_g * c + i_g * g_g
        h = o_g * jnp.tanh(c)
        return (h, c), h

    init = (jnp.zeros((B, H), jnp.float32), jnp.zeros((B, H), jnp.float32))
    _, ys = jax.lax.scan(step, init, jnp.transpose(x_bte, (1, 0, 2)))
    return jnp.transpose(ys, (1, 0, 2))


def _reference_forward(tokens, params):
    x = params["emb_table"][tokens]
    x = _lstm_layer_ref(x, params["wih1_t"], params["whh1_t"], params["b1"])
    x = _lstm_layer_ref(x, params["wih2_t"], params["whh2_t"], params["b2"])
    x = x[:, -1, :]
    return x @ params["wfc_t"] + params["bfc"]


def _init_params(key):
    ks = jax.random.split(key, 10)
    H, E = HIDDEN, EMBED_DIM
    s = 1.0 / jnp.sqrt(jnp.float32(H))

    def unif(k, shape):
        return jax.random.uniform(k, shape, jnp.float32, -s, s)

    return {
        "emb_table": jax.random.normal(ks[0], (MAX_TOKENS, E), jnp.float32),
        # Weights stored pre-transposed: x @ W_ih^T == x @ wih_t.
        "wih1_t": unif(ks[1], (E, 4 * H)),
        "whh1_t": unif(ks[2], (H, 4 * H)),
        "b1": (unif(ks[3], (1, 4 * H)) + unif(ks[4], (1, 4 * H))),  # b_ih + b_hh
        "wih2_t": unif(ks[5], (H, 4 * H)),
        "whh2_t": unif(ks[6], (H, 4 * H)),
        "b2": (unif(ks[7], (1, 4 * H)) + unif(ks[8], (1, 4 * H))),
        "wfc_t": unif(ks[9], (H, NUM_CLASSES)),
        "bfc": jnp.zeros((1, NUM_CLASSES), jnp.float32),
    }


if __name__ == "__main__":
    key = jax.random.PRNGKey(0)
    pkey, tkey = jax.random.split(key)
    params = _init_params(pkey)
    tokens = jax.random.randint(tkey, (BATCH, SEQ_LEN), 0, MAX_TOKENS, jnp.int32)

    # Pack once, outside the per-call forward path.
    w_slab = jax.block_until_ready(pack_params(params))

    out = lstm_distilled_forward(tokens, w_slab)
    out = jax.block_until_ready(out)

    ref = _reference_forward(tokens, params)
    assert out.shape == (BATCH, NUM_CLASSES)
    assert jnp.allclose(out, ref, atol=1e-4, rtol=1e-4), (out, ref)

    print("KERNEL_OK")
</pallas_src>

<mosaic_0001>
module attributes {stable_mosaic.version = 11 : i64} {
  func.func @_lstm_fc_kernel(%arg0: memref<16x1xi32, #tpu.memory_space<vmem>>, %arg1: memref<264x128xf32, #tpu.memory_space<vmem>>, %arg2: memref<2x128xf32, #tpu.memory_space<vmem>>, %arg3: memref<16x128xf32, #tpu.memory_space<vmem>>) attributes {dimension_semantics = [], scalar_prefetch = 0 : i64, scratch_operands = 1 : i64, tpu.core_type = #tpu.core_type<tc>} {
    %c128 = arith.constant 128 : index
    %c0 = arith.constant 0 : index
    %0 = vector.load %arg1[%c128, %c0] : memref<264x128xf32, #tpu.memory_space<vmem>>, vector<32x128xf32>
    %c160 = arith.constant 160 : index
    %c0_0 = arith.constant 0 : index
    %1 = vector.load %arg1[%c160, %c0_0] : memref<264x128xf32, #tpu.memory_space<vmem>>, vector<32x128xf32>
    %c192 = arith.constant 192 : index
    %c0_1 = arith.constant 0 : index
    %2 = vector.load %arg1[%c192, %c0_1] : memref<264x128xf32, #tpu.memory_space<vmem>>, vector<32x128xf32>
    %c224 = arith.constant 224 : index
    %c0_2 = arith.constant 0 : index
    %3 = vector.load %arg1[%c224, %c0_2] : memref<264x128xf32, #tpu.memory_space<vmem>>, vector<32x128xf32>
    %c256 = arith.constant 256 : index
    %c0_3 = arith.constant 0 : index
    %4 = vector.load %arg1[%c256, %c0_3] : memref<264x128xf32, #tpu.memory_space<vmem>>, vector<8x128xf32>
    %5 = vector.extract_strided_slice %4 {offsets = [0, 0], sizes = [1, 128], strides = [1, 1]} : vector<8x128xf32> to vector<1x128xf32>
    %6 = vector.shape_cast %5 : vector<1x128xf32> to vector<1x128xf32>
    %7 = vector.broadcast %6 : vector<1x128xf32> to vector<2x128xf32>
    %8 = vector.extract_strided_slice %4 {offsets = [1, 0], sizes = [1, 128], strides = [1, 1]} : vector<8x128xf32> to vector<1x128xf32>
    %c0_4 = arith.constant 0 : index
    %c0_5 = arith.constant 0 : index
    %9 = vector.load %arg0[%c0_4, %c0_5] : memref<16x1xi32, #tpu.memory_space<vmem>>, vector<16x1xi32>
    %10 = tpu.iota {dimensions = array<i32: 1>} : vector<16x128xi32>
    %11 = vector.broadcast %9 : vector<16x1xi32> to vector<16x128xi32>
    %12 = arith.cmpi eq, %10, %11 : vector<16x128xi32>
    %13 = arith.extui %12 : vector<16x128xi1> to vector<16x128xi32>
    %14 = arith.sitofp %13 : vector<16x128xi32> to vector<16x128xf32>
    %c0_6 = arith.constant 0 : index
    %c0_7 = arith.constant 0 : index
    %15 = vector.load %arg1[%c0_6, %c0_7] : memref<264x128xf32, #tpu.memory_space<vmem>>, vector<128x128xf32>
    %cst = arith.constant dense<0.000000e+00> : vector<16x128xf32>
    %16 = tpu.matmul %14, %15, %cst {dimension_numbers = #tpu.dot_dimension_numbers<[1], [0], [0], [1], [0, 0, 1, 1], [], []>} : vector<16x128xf32>, vector<128x128xf32>, vector<16x128xf32> -> vector<16x128xf32>
    %c0_8 = arith.constant 0 : index
    %c0_9 = arith.constant 0 : index
    %17 = vector.load %arg3[%c0_8, %c0_9] : memref<16x128xf32, #tpu.memory_space<vmem>>, vector<16x128xf32>
    tpu.vector_store %arg3[%c0_8, %c0_9], %16 {strides = array<i32>} : memref<16x128xf32, #tpu.memory_space<vmem>>, vector<16x128xf32>,
    %cst_10 = arith.constant 0.000000e+00 : f32
    %18 = vector.broadcast %cst_10 : f32 to vector<2x32xf32>
    %cst_11 = arith.constant 0.000000e+00 : f32
    %19 = vector.broadcast %cst_11 : f32 to vector<2x32xf32>
    %cst_12 = arith.constant 0.000000e+00 : f32
    %20 = vector.broadcast %cst_12 : f32 to vector<2x32xf32>
    %cst_13 = arith.constant 0.000000e+00 : f32
    %21 = vector.broadcast %cst_13 : f32 to vector<2x32xf32>
    %c0_14 = arith.constant 0 : index
    %c0_15 = arith.constant 0 : index
    %22 = vector.load %arg3[%c0_14, %c0_15] : memref<16x128xf32, #tpu.memory_space<vmem>>, vector<2x128xf32>
    %cst_16 = arith.constant dense<0.000000e+00> : vector<2x128xf32>
    %23 = tpu.matmul %18, %0, %cst_16 {dimension_numbers = #tpu.dot_dimension_numbers<[1], [0], [0], [1], [0, 0, 1, 1], [], []>} : vector<2x32xf32>, vector<32x128xf32>, vector<2x128xf32> -> vector<2x128xf32>
    %24 = arith.addf %22, %23 : vector<2x128xf32>
    %25 = arith.negf %24 : vector<2x128xf32>
    %26 = math.exp %25 : vector<2x128xf32>
    %cst_17 = arith.constant 1.000000e+00 : f32
    %27 = vector.broadcast %cst_17 : f32 to vector<2x128xf32>
    %28 = arith.addf %27, %26 : vector<2x128xf32>
    %29 = arith.divf %27, %28 : vector<2x128xf32>
    %30 = math.tanh %24 : vector<2x128xf32>
    %31 = vector.extract_strided_slice %29 {offsets = [0, 0], sizes = [2, 32], strides = [1, 1]} : vector<2x128xf32> to vector<2x32xf32>
    %32 = vector.extract_strided_slice %29 {offsets = [0, 32], sizes = [2, 32], strides = [1, 1]} : vector<2x128xf32> to vector<2x32xf32>
    %33 = vector.extract_strided_slice %30 {offsets = [0, 64], sizes = [2, 32], strides = [1, 1]} : vector<2x128xf32> to vector<2x32xf32>
    %34 = vector.extract_strided_slice %29 {offsets = [0, 96], sizes = [2, 32], strides = [1, 1]} : vector<2x128xf32> to vector<2x32xf32>
    %35 = arith.mulf %32, %19 : vector<2x32xf32>
    %36 = arith.mulf %31, %33 : vector<2x32xf32>
    %37 = arith.addf %35, %36 : vector<2x32xf32>
    %38 = math.tanh %37 : vector<2x32xf32>
    %39 = arith.mulf %34, %38 : vector<2x32xf32>
    %cst_18 = arith.constant dense<0.000000e+00> : vector<2x128xf32>
    %40 = tpu.matmul %39, %1, %cst_18 {dimension_numbers = #tpu.dot_dimension_numbers<[1], [0], [0], [1], [0, 0, 1, 1], [], []>} : vector<2x32xf32>, vector<32x128xf32>, vector<2x128xf32> -> vector<2x128xf32>
    %cst_19 = arith.constant dense<0.000000e+00> : vector<2x128xf32>
    %41 = tpu.matmul %20, %2, %cst_19 {dimension_numbers = #tpu.dot_dimension_numbers<[1], [0], [0], [1], [0, 0, 1, 1], [], []>} : vector<2x32xf32>, vector<32x128xf32>, vector<2x128xf32> -> vector<2x128xf32>
    %42 = arith.addf %40, %41 : vector<2x128xf32>
    %43 = arith.addf %42, %7 : vector<2x128xf32>
    %44 = arith.negf %43 : vector<2x128xf32>
    %45 = math.exp %44 : vector<2x128xf32>
    %cst_20 = arith.constant 1.000000e+00 : f32
    %46 = vector.broadcast %cst_20 : f32 to vector<2x128xf32>
    %47 = arith.addf %46, %45 : vector<2x128xf32>
    %48 = arith.divf %46, %47 : vector<2x128xf32>
    %49 = math.tanh %43 : vector<2x128xf32>
    %50 = vector.extract_strided_slice %48 {offsets = [0, 0], sizes = [2, 32], strides = [1, 1]} : vector<2x128xf32> to vector<2x32xf32>
    %51 = vector.extract_strided_slice %48 {offsets = [0, 32], sizes = [2, 32], strides = [1, 1]} : vector<2x128xf32> to vector<2x32xf32>
    %52 = vector.extract_strided_slice %49 {offsets = [0, 64], sizes = [2, 32], strides = [1, 1]} : vector<2x128xf32> to vector<2x32xf32>
    %53 = vector.extract_strided_slice %48 {offsets = [0, 96], sizes = [2, 32], strides = [1, 1]} : vector<2x128xf32> to vector<2x32xf32>
    %54 = arith.mulf %51, %21 : vector<2x32xf32>
    %55 = arith.mulf %50, %52 : vector<2x32xf32>
    %56 = arith.addf %54, %55 : vector<2x32xf32>
    %57 = math.tanh %56 : vector<2x32xf32>
    %58 = arith.mulf %53, %57 : vector<2x32xf32>
    %c2 = arith.constant 2 : index
    %c0_21 = arith.constant 0 : index
    %59 = vector.load %arg3[%c2, %c0_21] : memref<16x128xf32, #tpu.memory_space<vmem>>, vector<2x128xf32>
    %cst_22 = arith.constant dense<0.000000e+00> : vector<2x128xf32>
    %60 = tpu.matmul %39, %0, %cst_22 {dimension_numbers = #tpu.dot_dimension_numbers<[1], [0], [0], [1], [0, 0, 1, 1], [], []>} : vector<2x32xf32>, vector<32x128xf32>, vector<2x128xf32> -> vector<2x128xf32>
    %61 = arith.addf %59, %60 : vector<2x128xf32>
    %62 = arith.negf %61 : vector<2x128xf32>
    %63 = math.exp %62 : vector<2x128xf32>
    %cst_23 = arith.constant 1.000000e+00 : f32
    %64 = vector.broadcast %cst_23 : f32 to vector<2x128xf32>
    %65 = arith.addf %64, %63 : vector<2x128xf32>
    %66 = arith.divf %64, %65 : vector<2x128xf32>
    %67 = math.tanh %61 : vector<2x128xf32>
    %68 = vector.extract_strided_slice %66 {offsets = [0, 0], sizes = [2, 32], strides = [1, 1]} : vector<2x128xf32> to vector<2x32xf32>
    %69 = vector.extract_strided_slice %66 {offsets = [0, 32], sizes = [2, 32], strides = [1, 1]} : vector<2x128xf32> to vector<2x32xf32>
    %70 = vector.extract_strided_slice %67 {offsets = [0, 64], sizes = [2, 32], strides = [1, 1]} : vector<2x128xf32> to vector<2x32xf32>
    %71 = vector.extract_strided_slice %66 {offsets = [0, 96], sizes = [2, 32], strides = [1, 1]} : vector<2x128xf32> to vector<2x32xf32>
    %72 = arith.mulf %69, %37 : vector<2x32xf32>
    %73 = arith.mulf %68, %70 : vector<2x32xf32>
    %74 = arith.addf %72, %73 : vector<2x32xf32>
    %75 = math.tanh %74 : vector<2x32xf32>
    %76 = arith.mulf %71, %75 : vector<2x32xf32>
    %cst_24 = arith.constant dense<0.000000e+00> : vector<2x128xf32>
    %77 = tpu.matmul %76, %1, %cst_24 {dimension_numbers = #tpu.dot_dimension_numbers<[1], [0], [0], [1], [0, 0, 1, 1], [], []>} : vector<2x32xf32>, vector<32x128xf32>, vector<2x128xf32> -> vector<2x128xf32>
    %cst_25 = arith.constant dense<0.000000e+00> : vector<2x128xf32>
    %78 = tpu.matmul %58, %2, %cst_25 {dimension_numbers = #tpu.dot_dimension_numbers<[1], [0], [0], [1], [0, 0, 1, 1], [], []>} : vector<2x32xf32>, vector<32x128xf32>, vector<2x128xf32> -> vector<2x128xf32>
    %79 = arith.addf %77, %78 : vector<2x128xf32>
    %80 = arith.addf %79, %7 : vector<2x128xf32>
    %81 = arith.negf %80 : vector<2x128xf32>
    %82 = math.exp %81 : vector<2x128xf32>
    %cst_26 = arith.constant 1.000000e+00 : f32
    %83 = vector.broadcast %cst_26 : f32 to vector<2x128xf32>
    %84 = arith.addf %83, %82 : vector<2x128xf32>
    %85 = arith.divf %83, %84 : vector<2x128xf32>
    %86 = math.tanh %80 : vector<2x128xf32>
    %87 = vector.extract_strided_slice %85 {offsets = [0, 0], sizes = [2, 32], strides = [1, 1]} : vector<2x128xf32> to vector<2x32xf32>
    %88 = vector.extract_strided_slice %85 {offsets = [0, 32], sizes = [2, 32], strides = [1, 1]} : vector<2x128xf32> to vector<2x32xf32>
    %89 = vector.extract_strided_slice %86 {offsets = [0, 64], sizes = [2, 32], strides = [1, 1]} : vector<2x128xf32> to vector<2x32xf32>
    %90 = vector.extract_strided_slice %85 {offsets = [0, 96], sizes = [2, 32], strides = [1, 1]} : vector<2x128xf32> to vector<2x32xf32>
    %91 = arith.mulf %88, %56 : vector<2x32xf32>
    %92 = arith.mulf %87, %89 : vector<2x32xf32>
    %93 = arith.addf %91, %92 : vector<2x32xf32>
    %94 = math.tanh %93 : vector<2x32xf32>
    %95 = arith.mulf %90, %94 : vector<2x32xf32>
    %c4 = arith.constant 4 : index
    %c0_27 = arith.constant 0 : index
    %96 = vector.load %arg3[%c4, %c0_27] : memref<16x128xf32, #tpu.memory_space<vmem>>, vector<2x128xf32>
    %cst_28 = arith.constant dense<0.000000e+00> : vector<2x128xf32>
    %97 = tpu.matmul %76, %0, %cst_28 {dimension_numbers = #tpu.dot_dimension_numbers<[1], [0], [0], [1], [0, 0, 1, 1], [], []>} : vector<2x32xf32>, vector<32x128xf32>, vector<2x128xf32> -> vector<2x128xf32>
    %98 = arith.addf %96, %97 : vector<2x128xf32>
    %99 = arith.negf %98 : vector<2x128xf32>
    %100 = math.exp %99 : vector<2x128xf32>
    %cst_29 = arith.constant 1.000000e+00 : f32
    %101 = vector.broadcast %cst_29 : f32 to vector<2x128xf32>
    %102 = arith.addf %101, %100 : vector<2x128xf32>
    %103 = arith.divf %101, %102 : vector<2x128xf32>
    %104 = math.tanh %98 : vector<2x128xf32>
    %105 = vector.extract_strided_slice %103 {offsets = [0, 0], sizes = [2, 32], strides = [1, 1]} : vector<2x128xf32> to vector<2x32xf32>
    %106 = vector.extract_strided_slice %103 {offsets = [0, 32], sizes = [2, 32], strides = [1, 1]} : vector<2x128xf32> to vector<2x32xf32>
    %107 = vector.extract_strided_slice %104 {offsets = [0, 64], sizes = [2, 32], strides = [1, 1]} : vector<2x128xf32> to vector<2x32xf32>
    %108 = vector.extract_strided_slice %103 {offsets = [0, 96], sizes = [2, 32], strides = [1, 1]} : vector<2x128xf32> to vector<2x32xf32>
    %109 = arith.mulf %106, %74 : vector<2x32xf32>
    %110 = arith.mulf %105, %107 : vector<2x32xf32>
    %111 = arith.addf %109, %110 : vector<2x32xf32>
    %112 = math.tanh %111 : vector<2x32xf32>
    %113 = arith.mulf %108, %112 : vector<2x32xf32>
    %cst_30 = arith.constant dense<0.000000e+00> : vector<2x128xf32>
    %114 = tpu.matmul %113, %1, %cst_30 {dimension_numbers = #tpu.dot_dimension_numbers<[1], [0], [0], [1], [0, 0, 1, 1], [], []>} : vector<2x32xf32>, vector<32x128xf32>, vector<2x128xf32> -> vector<2x128xf32>
    %cst_31 = arith.constant dense<0.000000e+00> : vector<2x128xf32>
    %115 = tpu.matmul %95, %2, %cst_31 {dimension_numbers = #tpu.dot_dimension_numbers<[1], [0], [0], [1], [0, 0, 1, 1], [], []>} : vector<2x32xf32>, vector<32x128xf32>, vector<2x128xf32> -> vector<2x128xf32>
    %116 = arith.addf %114, %115 : vector<2x128xf32>
    %117 = arith.addf %116, %7 : vector<2x128xf32>
    %118 = arith.negf %117 : vector<2x128xf32>
    %119 = math.exp %118 : vector<2x128xf32>
    %cst_32 = arith.constant 1.000000e+00 : f32
    %120 = vector.broadcast %cst_32 : f32 to vector<2x128xf32>
    %121 = arith.addf %120, %119 : vector<2x128xf32>
    %122 = arith.divf %120, %121 : vector<2x128xf32>
    %123 = math.tanh %117 : vector<2x128xf32>
    %124 = vector.extract_strided_slice %122 {offsets = [0, 0], sizes = [2, 32], strides = [1, 1]} : vector<2x128xf32> to vector<2x32xf32>
    %125 = vector.extract_strided_slice %122 {offsets = [0, 32], sizes = [2, 32], strides = [1, 1]} : vector<2x128xf32> to vector<2x32xf32>
    %126 = vector.extract_strided_slice %123 {offsets = [0, 64], sizes = [2, 32], strides = [1, 1]} : vector<2x128xf32> to vector<2x32xf32>
    %127 = vector.extract_strided_slice %122 {offsets = [0, 96], sizes = [2, 32], strides = [1, 1]} : vector<2x128xf32> to vector<2x32xf32>
    %128 = arith.mulf %125, %93 : vector<2x32xf32>
    %129 = arith.mulf %124, %126 : vector<2x32xf32>
    %130 = arith.addf %128, %129 : vector<2x32xf32>
    %131 = math.tanh %130 : vector<2x32xf32>
    %132 = arith.mulf %127, %131 : vector<2x32xf32>
    %c6 = arith.constant 6 : index
    %c0_33 = arith.constant 0 : index
    %133 = vector.load %arg3[%c6, %c0_33] : memref<16x128xf32, #tpu.memory_space<vmem>>, vector<2x128xf32>
    %cst_34 = arith.constant dense<0.000000e+00> : vector<2x128xf32>
    %134 = tpu.matmul %113, %0, %cst_34 {dimension_numbers = #tpu.dot_dimension_numbers<[1], [0], [0], [1], [0, 0, 1, 1], [], []>} : vector<2x32xf32>, vector<32x128xf32>, vector<2x128xf32> -> vector<2x128xf32>
    %135 = arith.addf %133, %134 : vector<2x128xf32>
    %136 = arith.negf %135 : vector<2x128xf32>
    %137 = math.exp %136 : vector<2x128xf32>
    %cst_35 = arith.constant 1.000000e+00 : f32
    %138 = vector.broadcast %cst_35 : f32 to vector<2x128xf32>
    %139 = arith.addf %138, %137 : vector<2x128xf32>
    %140 = arith.divf %138, %139 : vector<2x128xf32>
    %141 = math.tanh %135 : vector<2x128xf32>
    %142 = vector.extract_strided_slice %140 {offsets = [0, 0], sizes = [2, 32], strides = [1, 1]} : vector<2x128xf32> to vector<2x32xf32>
    %143 = vector.extract_strided_slice %140 {offsets = [0, 32], sizes = [2, 32], strides = [1, 1]} : vector<2x128xf32> to vector<2x32xf32>
    %144 = vector.extract_strided_slice %141 {offsets = [0, 64], sizes = [2, 32], strides = [1, 1]} : vector<2x128xf32> to vector<2x32xf32>
    %145 = vector.extract_strided_slice %140 {offsets = [0, 96], sizes = [2, 32], strides = [1, 1]} : vector<2x128xf32> to vector<2x32xf32>
    %146 = arith.mulf %143, %111 : vector<2x32xf32>
    %147 = arith.mulf %142, %144 : vector<2x32xf32>
    %148 = arith.addf %146, %147 : vector<2x32xf32>
    %149 = math.tanh %148 : vector<2x32xf32>
    %150 = arith.mulf %145, %149 : vector<2x32xf32>
    %cst_36 = arith.constant dense<0.000000e+00> : vector<2x128xf32>
    %151 = tpu.matmul %150, %1, %cst_36 {dimension_numbers = #tpu.dot_dimension_numbers<[1], [0], [0], [1], [0, 0, 1, 1], [], []>} : vector<2x32xf32>, vector<32x128xf32>, vector<2x128xf32> -> vector<2x128xf32>
    %cst_37 = arith.constant dense<0.000000e+00> : vector<2x128xf32>
    %152 = tpu.matmul %132, %2, %cst_37 {dimension_numbers = #tpu.dot_dimension_numbers<[1], [0], [0], [1], [0, 0, 1, 1], [], []>} : vector<2x32xf32>, vector<32x128xf32>, vector<2x128xf32> -> vector<2x128xf32>
    %153 = arith.addf %151, %152 : vector<2x128xf32>
    %154 = arith.addf %153, %7 : vector<2x128xf32>
    %155 = arith.negf %154 : vector<2x128xf32>
    %156 = math.exp %155 : vector<2x128xf32>
    %cst_38 = arith.constant 1.000000e+00 : f32
    %157 = vector.broadcast %cst_38 : f32 to vector<2x128xf32>
    %158 = arith.addf %157, %156 : vector<2x128xf32>
    %159 = arith.divf %157, %158 : vector<2x128xf32>
    %160 = math.tanh %154 : vector<2x128xf32>
    %161 = vector.extract_strided_slice %159 {offsets = [0, 0], sizes = [2, 32], strides = [1, 1]} : vector<2x128xf32> to vector<2x32xf32>
    %162 = vector.extract_strided_slice %159 {offsets = [0, 32], sizes = [2, 32], strides = [1, 1]} : vector<2x128xf32> to vector<2x32xf32>
    %163 = vector.extract_strided_slice %160 {offsets = [0, 64], sizes = [2, 32], strides = [1, 1]} : vector<2x128xf32> to vector<2x32xf32>
    %164 = vector.extract_strided_slice %159 {offsets = [0, 96], sizes = [2, 32], strides = [1, 1]} : vector<2x128xf32> to vector<2x32xf32>
    %165 = arith.mulf %162, %130 : vector<2x32xf32>
    %166 = arith.mulf %161, %163 : vector<2x32xf32>
    %167 = arith.addf %165, %166 : vector<2x32xf32>
    %168 = math.tanh %167 : vector<2x32xf32>
    %169 = arith.mulf %164, %168 : vector<2x32xf32>
    %c8 = arith.constant 8 : index
    %c0_39 = arith.constant 0 : index
    %170 = vector.load %arg3[%c8, %c0_39] : memref<16x128xf32, #tpu.memory_space<vmem>>, vector<2x128xf32>
    %cst_40 = arith.constant dense<0.000000e+00> : vector<2x128xf32>
    %171 = tpu.matmul %150, %0, %cst_40 {dimension_numbers = #tpu.dot_dimension_numbers<[1], [0], [0], [1], [0, 0, 1, 1], [], []>} : vector<2x32xf32>, vector<32x128xf32>, vector<2x128xf32> -> vector<2x128xf32>
    %172 = arith.addf %170, %171 : vector<2x128xf32>
    %173 = arith.negf %172 : vector<2x128xf32>
    %174 = math.exp %173 : vector<2x128xf32>
    %cst_41 = arith.constant 1.000000e+00 : f32
    %175 = vector.broadcast %cst_41 : f32 to vector<2x128xf32>
    %176 = arith.addf %175, %174 : vector<2x128xf32>
    %177 = arith.divf %175, %176 : vector<2x128xf32>
    %178 = math.tanh %172 : vector<2x128xf32>
    %179 = vector.extract_strided_slice %177 {offsets = [0, 0], sizes = [2, 32], strides = [1, 1]} : vector<2x128xf32> to vector<2x32xf32>
    %180 = vector.extract_strided_slice %177 {offsets = [0, 32], sizes = [2, 32], strides = [1, 1]} : vector<2x128xf32> to vector<2x32xf32>
    %181 = vector.extract_strided_slice %178 {offsets = [0, 64], sizes = [2, 32], strides = [1, 1]} : vector<2x128xf32> to vector<2x32xf32>
    %182 = vector.extract_strided_slice %177 {offsets = [0, 96], sizes = [2, 32], strides = [1, 1]} : vector<2x128xf32> to vector<2x32xf32>
    %183 = arith.mulf %180, %148 : vector<2x32xf32>
    %184 = arith.mulf %179, %181 : vector<2x32xf32>
    %185 = arith.addf %183, %184 : vector<2x32xf32>
    %186 = math.tanh %185 : vector<2x32xf32>
    %187 = arith.mulf %182, %186 : vector<2x32xf32>
    %cst_42 = arith.constant dense<0.000000e+00> : vector<2x128xf32>
    %188 = tpu.matmul %187, %1, %cst_42 {dimension_numbers = #tpu.dot_dimension_numbers<[1], [0], [0], [1], [0, 0, 1, 1], [], []>} : vector<2x32xf32>, vector<32x128xf32>, vector<2x128xf32> -> vector<2x128xf32>
    %cst_43 = arith.constant dense<0.000000e+00> : vector<2x128xf32>
    %189 = tpu.matmul %169, %2, %cst_43 {dimension_numbers = #tpu.dot_dimension_numbers<[1], [0], [0], [1], [0, 0, 1, 1], [], []>} : vector<2x32xf32>, vector<32x128xf32>, vector<2x128xf32> -> vector<2x128xf32>
    %190 = arith.addf %188, %189 : vector<2x128xf32>
    %191 = arith.addf %190, %7 : vector<2x128xf32>
    %192 = arith.negf %191 : vector<2x128xf32>
    %193 = math.exp %192 : vector<2x128xf32>
    %cst_44 = arith.constant 1.000000e+00 : f32
    %194 = vector.broadcast %cst_44 : f32 to vector<2x128xf32>
    %195 = arith.addf %194, %193 : vector<2x128xf32>
    %196 = arith.divf %194, %195 : vector<2x128xf32>
    %197 = math.tanh %191 : vector<2x128xf32>
    %198 = vector.extract_strided_slice %196 {offsets = [0, 0], sizes = [2, 32], strides = [1, 1]} : vector<2x128xf32> to vector<2x32xf32>
    %199 = vector.extract_strided_slice %196 {offsets = [0, 32], sizes = [2, 32], strides = [1, 1]} : vector<2x128xf32> to vector<2x32xf32>
    %200 = vector.extract_strided_slice %197 {offsets = [0, 64], sizes = [2, 32], strides = [1, 1]} : vector<2x128xf32> to vector<2x32xf32>
    %201 = vector.extract_strided_slice %196 {offsets = [0, 96], sizes = [2, 32], strides = [1, 1]} : vector<2x128xf32> to vector<2x32xf32>
    %202 = arith.mulf %199, %167 : vector<2x32xf32>
    %203 = arith.mulf %198, %200 : vector<2x32xf32>
    %204 = arith.addf %202, %203 : vector<2x32xf32>
    %205 = math.tanh %204 : vector<2x32xf32>
    %206 = arith.mulf %201, %205 : vector<2x32xf32>
    %c10 = arith.constant 10 : index
    %c0_45 = arith.constant 0 : index
    %207 = vector.load %arg3[%c10, %c0_45] : memref<16x128xf32, #tpu.memory_space<vmem>>, vector<2x128xf32>
    %cst_46 = arith.constant dense<0.000000e+00> : vector<2x128xf32>
    %208 = tpu.matmul %187, %0, %cst_46 {dimension_numbers = #tpu.dot_dimension_numbers<[1], [0], [0], [1], [0, 0, 1, 1], [], []>} : vector<2x32xf32>, vector<32x128xf32>, vector<2x128xf32> -> vector<2x128xf32>
    %209 = arith.addf %207, %208 : vector<2x128xf32>
    %210 = arith.negf %209 : vector<2x128xf32>
    %211 = math.exp %210 : vector<2x128xf32>
    %cst_47 = arith.constant 1.000000e+00 : f32
    %212 = vector.broadcast %cst_47 : f32 to vector<2x128xf32>
    %213 = arith.addf %212, %211 : vector<2x128xf32>
    %214 = arith.divf %212, %213 : vector<2x128xf32>
    %215 = math.tanh %209 : vector<2x128xf32>
    %216 = vector.extract_strided_slice %214 {offsets = [0, 0], sizes = [2, 32], strides = [1, 1]} : vector<2x128xf32> to vector<2x32xf32>
    %217 = vector.extract_strided_slice %214 {offsets = [0, 32], sizes = [2, 32], strides = [1, 1]} : vector<2x128xf32> to vector<2x32xf32>
    %218 = vector.extract_strided_slice %215 {offsets = [0, 64], sizes = [2, 32], strides = [1, 1]} : vector<2x128xf32> to vector<2x32xf32>
    %219 = vector.extract_strided_slice %214 {offsets = [0, 96], sizes = [2, 32], strides = [1, 1]} : vector<2x128xf32> to vector<2x32xf32>
    %220 = arith.mulf %217, %185 : vector<2x32xf32>
    %221 = arith.mulf %216, %218 : vector<2x32xf32>
    %222 = arith.addf %220, %221 : vector<2x32xf32>
    %223 = math.tanh %222 : vector<2x32xf32>
    %224 = arith.mulf %219, %223 : vector<2x32xf32>
    %cst_48 = arith.constant dense<0.000000e+00> : vector<2x128xf32>
    %225 = tpu.matmul %224, %1, %cst_48 {dimension_numbers = #tpu.dot_dimension_numbers<[1], [0], [0], [1], [0, 0, 1, 1], [], []>} : vector<2x32xf32>, vector<32x128xf32>, vector<2x128xf32> -> vector<2x128xf32>
    %cst_49 = arith.constant dense<0.000000e+00> : vector<2x128xf32>
    %226 = tpu.matmul %206, %2, %cst_49 {dimension_numbers = #tpu.dot_dimension_numbers<[1], [0], [0], [1], [0, 0, 1, 1], [], []>} : vector<2x32xf32>, vector<32x128xf32>, vector<2x128xf32> -> vector<2x128xf32>
    %227 = arith.addf %225, %226 : vector<2x128xf32>
    %228 = arith.addf %227, %7 : vector<2x128xf32>
    %229 = arith.negf %228 : vector<2x128xf32>
    %230 = math.exp %229 : vector<2x128xf32>
    %cst_50 = arith.constant 1.000000e+00 : f32
    %231 = vector.broadcast %cst_50 : f32 to vector<2x128xf32>
    %232 = arith.addf %231, %230 : vector<2x128xf32>
    %233 = arith.divf %231, %232 : vector<2x128xf32>
    %234 = math.tanh %228 : vector<2x128xf32>
    %235 = vector.extract_strided_slice %233 {offsets = [0, 0], sizes = [2, 32], strides = [1, 1]} : vector<2x128xf32> to vector<2x32xf32>
    %236 = vector.extract_strided_slice %233 {offsets = [0, 32], sizes = [2, 32], strides = [1, 1]} : vector<2x128xf32> to vector<2x32xf32>
    %237 = vector.extract_strided_slice %234 {offsets = [0, 64], sizes = [2, 32], strides = [1, 1]} : vector<2x128xf32> to vector<2x32xf32>
    %238 = vector.extract_strided_slice %233 {offsets = [0, 96], sizes = [2, 32], strides = [1, 1]} : vector<2x128xf32> to vector<2x32xf32>
    %239 = arith.mulf %236, %204 : vector<2x32xf32>
    %240 = arith.mulf %235, %237 : vector<2x32xf32>
    %241 = arith.addf %239, %240 : vector<2x32xf32>
    %242 = math.tanh %241 : vector<2x32xf32>
    %243 = arith.mulf %238, %242 : vector<2x32xf32>
    %c12 = arith.constant 12 : index
    %c0_51 = arith.constant 0 : index
    %244 = vector.load %arg3[%c12, %c0_51] : memref<16x128xf32, #tpu.memory_space<vmem>>, vector<2x128xf32>
    %cst_52 = arith.constant dense<0.000000e+00> : vector<2x128xf32>
    %245 = tpu.matmul %224, %0, %cst_52 {dimension_numbers = #tpu.dot_dimension_numbers<[1], [0], [0], [1], [0, 0, 1, 1], [], []>} : vector<2x32xf32>, vector<32x128xf32>, vector<2x128xf32> -> vector<2x128xf32>
    %246 = arith.addf %244, %245 : vector<2x128xf32>
    %247 = arith.negf %246 : vector<2x128xf32>
    %248 = math.exp %247 : vector<2x128xf32>
    %cst_53 = arith.constant 1.000000e+00 : f32
    %249 = vector.broadcast %cst_53 : f32 to vector<2x128xf32>
    %250 = arith.addf %249, %248 : vector<2x128xf32>
    %251 = arith.divf %249, %250 : vector<2x128xf32>
    %252 = math.tanh %246 : vector<2x128xf32>
    %253 = vector.extract_strided_slice %251 {offsets = [0, 0], sizes = [2, 32], strides = [1, 1]} : vector<2x128xf32> to vector<2x32xf32>
    %254 = vector.extract_strided_slice %251 {offsets = [0, 32], sizes = [2, 32], strides = [1, 1]} : vector<2x128xf32> to vector<2x32xf32>
    %255 = vector.extract_strided_slice %252 {offsets = [0, 64], sizes = [2, 32], strides = [1, 1]} : vector<2x128xf32> to vector<2x32xf32>
    %256 = vector.extract_strided_slice %251 {offsets = [0, 96], sizes = [2, 32], strides = [1, 1]} : vector<2x128xf32> to vector<2x32xf32>
    %257 = arith.mulf %254, %222 : vector<2x32xf32>
    %258 = arith.mulf %253, %255 : vector<2x32xf32>
    %259 = arith.addf %257, %258 : vector<2x32xf32>
    %260 = math.tanh %259 : vector<2x32xf32>
    %261 = arith.mulf %256, %260 : vector<2x32xf32>
    %cst_54 = arith.constant dense<0.000000e+00> : vector<2x128xf32>
    %262 = tpu.matmul %261, %1, %cst_54 {dimension_numbers = #tpu.dot_dimension_numbers<[1], [0], [0], [1], [0, 0, 1, 1], [], []>} : vector<2x32xf32>, vector<32x128xf32>, vector<2x128xf32> -> vector<2x128xf32>
    %cst_55 = arith.constant dense<0.000000e+00> : vector<2x128xf32>
    %263 = tpu.matmul %243, %2, %cst_55 {dimension_numbers = #tpu.dot_dimension_numbers<[1], [0], [0], [1], [0, 0, 1, 1], [], []>} : vector<2x32xf32>, vector<32x128xf32>, vector<2x128xf32> -> vector<2x128xf32>
    %264 = arith.addf %262, %263 : vector<2x128xf32>
    %265 = arith.addf %264, %7 : vector<2x128xf32>
    %266 = arith.negf %265 : vector<2x128xf32>
    %267 = math.exp %266 : vector<2x128xf32>
    %cst_56 = arith.constant 1.000000e+00 : f32
    %268 = vector.broadcast %cst_56 : f32 to vector<2x128xf32>
    %269 = arith.addf %268, %267 : vector<2x128xf32>
    %270 = arith.divf %268, %269 : vector<2x128xf32>
    %271 = math.tanh %265 : vector<2x128xf32>
    %272 = vector.extract_strided_slice %270 {offsets = [0, 0], sizes = [2, 32], strides = [1, 1]} : vector<2x128xf32> to vector<2x32xf32>
    %273 = vector.extract_strided_slice %270 {offsets = [0, 32], sizes = [2, 32], strides = [1, 1]} : vector<2x128xf32> to vector<2x32xf32>
    %274 = vector.extract_strided_slice %271 {offsets = [0, 64], sizes = [2, 32], strides = [1, 1]} : vector<2x128xf32> to vector<2x32xf32>
    %275 = vector.extract_strided_slice %270 {offsets = [0, 96], sizes = [2, 32], strides = [1, 1]} : vector<2x128xf32> to vector<2x32xf32>
    %276 = arith.mulf %273, %241 : vector<2x32xf32>
    %277 = arith.mulf %272, %274 : vector<2x32xf32>
    %278 = arith.addf %276, %277 : vector<2x32xf32>
    %279 = math.tanh %278 : vector<2x32xf32>
    %280 = arith.mulf %275, %279 : vector<2x32xf32>
    %c14 = arith.constant 14 : index
    %c0_57 = arith.constant 0 : index
    %281 = vector.load %arg3[%c14, %c0_57] : memref<16x128xf32, #tpu.memory_space<vmem>>, vector<2x128xf32>
    %cst_58 = arith.constant dense<0.000000e+00> : vector<2x128xf32>
    %282 = tpu.matmul %261, %0, %cst_58 {dimension_numbers = #tpu.dot_dimension_numbers<[1], [0], [0], [1], [0, 0, 1, 1], [], []>} : vector<2x32xf32>, vector<32x128xf32>, vector<2x128xf32> -> vector<2x128xf32>
    %283 = arith.addf %281, %282 : vector<2x128xf32>
    %284 = arith.negf %283 : vector<2x128xf32>
    %285 = math.exp %284 : vector<2x128xf32>
    %cst_59 = arith.constant 1.000000e+00 : f32
    %286 = vector.broadcast %cst_59 : f32 to vector<2x128xf32>
    %287 = arith.addf %286, %285 : vector<2x128xf32>
    %288 = arith.divf %286, %287 : vector<2x128xf32>
    %289 = math.tanh %283 : vector<2x128xf32>
    %290 = vector.extract_strided_slice %288 {offsets = [0, 0], sizes = [2, 32], strides = [1, 1]} : vector<2x128xf32> to vector<2x32xf32>
    %291 = vector.extract_strided_slice %288 {offsets = [0, 32], sizes = [2, 32], strides = [1, 1]} : vector<2x128xf32> to vector<2x32xf32>
    %292 = vector.extract_strided_slice %289 {offsets = [0, 64], sizes = [2, 32], strides = [1, 1]} : vector<2x128xf32> to vector<2x32xf32>
    %293 = vector.extract_strided_slice %288 {offsets = [0, 96], sizes = [2, 32], strides = [1, 1]} : vector<2x128xf32> to vector<2x32xf32>
    %294 = arith.mulf %291, %259 : vector<2x32xf32>
    %295 = arith.mulf %290, %292 : vector<2x32xf32>
    %296 = arith.addf %294, %295 : vector<2x32xf32>
    %297 = math.tanh %296 : vector<2x32xf32>
    %298 = arith.mulf %293, %297 : vector<2x32xf32>
    %cst_60 = arith.constant dense<0.000000e+00> : vector<2x128xf32>
    %299 = tpu.matmul %298, %1, %cst_60 {dimension_numbers = #tpu.dot_dimension_numbers<[1], [0], [0], [1], [0, 0, 1, 1], [], []>} : vector<2x32xf32>, vector<32x128xf32>, vector<2x128xf32> -> vector<2x128xf32>
    %cst_61 = arith.constant dense<0.000000e+00> : vector<2x128xf32>
    %300 = tpu.matmul %280, %2, %cst_61 {dimension_numbers = #tpu.dot_dimension_numbers<[1], [0], [0], [1], [0, 0, 1, 1], [], []>} : vector<2x32xf32>, vector<32x128xf32>, vector<2x128xf32> -> vector<2x128xf32>
    %301 = arith.addf %299, %300 : vector<2x128xf32>
    %302 = arith.addf %301, %7 : vector<2x128xf32>
    %303 = arith.negf %302 : vector<2x128xf32>
    %304 = math.exp %303 : vector<2x128xf32>
    %cst_62 = arith.constant 1.000000e+00 : f32
    %305 = vector.broadcast %cst_62 : f32 to vector<2x128xf32>
    %306 = arith.addf %305, %304 : vector<2x128xf32>
    %307 = arith.divf %305, %306 : vector<2x128xf32>
    %308 = math.tanh %302 : vector<2x128xf32>
    %309 = vector.extract_strided_slice %307 {offsets = [0, 0], sizes = [2, 32], strides = [1, 1]} : vector<2x128xf32> to vector<2x32xf32>
    %310 = vector.extract_strided_slice %307 {offsets = [0, 32], sizes = [2, 32], strides = [1, 1]} : vector<2x128xf32> to vector<2x32xf32>
    %311 = vector.extract_strided_slice %308 {offsets = [0, 64], sizes = [2, 32], strides = [1, 1]} : vector<2x128xf32> to vector<2x32xf32>
    %312 = vector.extract_strided_slice %307 {offsets = [0, 96], sizes = [2, 32], strides = [1, 1]} : vector<2x128xf32> to vector<2x32xf32>
    %313 = arith.mulf %310, %278 : vector<2x32xf32>
    %314 = arith.mulf %309, %311 : vector<2x32xf32>
    %315 = arith.addf %313, %314 : vector<2x32xf32>
    %316 = math.tanh %315 : vector<2x32xf32>
    %317 = arith.mulf %312, %316 : vector<2x32xf32>
    %cst_63 = arith.constant dense<0.000000e+00> : vector<2x128xf32>
    %318 = tpu.matmul %317, %3, %cst_63 {dimension_numbers = #tpu.dot_dimension_numbers<[1], [0], [0], [1], [0, 0, 1, 1], [], []>} : vector<2x32xf32>, vector<32x128xf32>, vector<2x128xf32> -> vector<2x128xf32>
    %319 = vector.broadcast %8 : vector<1x128xf32> to vector<2x128xf32>
    %320 = arith.addf %318, %319 : vector<2x128xf32>
    %c0_64 = arith.constant 0 : index
    %c0_65 = arith.constant 0 : index
    %321 = vector.load %arg2[%c0_64, %c0_65] : memref<2x128xf32, #tpu.memory_space<vmem>>, vector<2x128xf32>
    tpu.vector_store %arg2[%c0_64, %c0_65], %320 {strides = array<i32>} : memref<2x128xf32, #tpu.memory_space<vmem>>, vector<2x128xf32>,
    return
  }
}

</mosaic_0001>

<bundles_post_ra>
// kernel: lstm_distilled_forward.1
= control target key start
LH: loop header
LB: loop body
LE: loop exit
PB: predicated region body
PF: predicated region fallthrough
CT: control target
= control target key end

     0   :  { %7 = vsyncpa [#allocation4], 0  ;;  %s3658_s0 = inlined_call_operand.vmem [shape: s32[16,1], index: 0, kind: input, shape index: {}]   ;;  %s3659_s1 = inlined_call_operand.hbm [shape: f32[264,128], index: 1, kind: input, shape index: {}]   ;;  %s3660_s2 = inlined_call_operand.hbm [shape: f32[2,128], index: 2, kind: output, shape index: {}]  }
   0x1   :  { %8 = vsyncpa [#allocation5], 0  ;;  %s3285_s9 = smov [#allocation3]   ;;  %s3237_s13 = scalar_lea.hbm %s3659_s1, 4224 }
   0x2   :  { %s16_s10 = sshll.u32 %s3285_s9, 4  ;;  %p3238_p0 = scmp.ne.s32.totalorder %s3659_s1, %s3237_s13  ;;  %s17_s10 = int_to_ptr.vmem [resolvable:$true] %s16_s10 }
   0x3   :  { %p3241_p1 = scmp.lt.u32.totalorder %s3237_s13, %s3659_s1 }
   0x5   :  { %p3243_p2 = pnand %p3241_p1, %p3238_p0 }
   0x7   :  { %3246 = shalt.err (!%p3243_p2)
}
   0x8   :  { %s3247_s18 = scalar_lea.vmem %s17_s10, 4224  ;;  %p3252_p4 = scmp.lt.s32.totalorder %s17_s10, %s17_s10 }
   0x9   :  { %p3248_p3 = scmp.ne.s32.totalorder %s17_s10, %s3247_s18  ;;  %p3253_p5 = scmp.lt.s32.totalorder %s3247_s18, %s3247_s18 }
   0xb   :  { %p3254_p6 = por %p3253_p5, %p3252_p4 }
   0xd   :  { %p3255_p7 = pnand %p3254_p6, %p3248_p3 }
   0xf   :  { %3258 = shalt.err (!%p3255_p7)
}
  0x10   :  { %s3286_s19 = smov 128   ;;  %s3287_s20 = smov 8  }
  0x11   :  { %22 = dma.hbm_to_vmem [thread:$0]  %s3659_s1, 4224, %s17_s10, [#allocation4], %s3286_s19, %s3286_s19, %s3287_s20  }
  0x12   :  { %3281 = dma.done.wait [#allocation4], 4224  }
  0x13   :  { %3282 = vsyncadd [#allocation4], 4294963072  ;;  %v3288_v0 = vmov 0   ;;  %v47_v1 = vld [vmem:[%s3658_s0] sm:$0xff]  ;;  %v63_v2 = vld [vmem:[#allocation3] sm:$0xff]  ;;  %v3289_v13 = vmov 0.0|0.0   ;;  %v43_v35 = vlaneseq }
  0x14   :  { %3107 = vset.pattern.permute.xlu0 %v3288_v0  ;;  %v64_v3 = vld [vmem:[#allocation3 + $0x8] sm:$0xff]  ;;  %v65_v4 = vld [vmem:[#allocation3 + $0x10] sm:$0xff]  ;;  %v66_v5 = vld [vmem:[#allocation3 + $0x18] sm:$0xff]  ;;  %2946 = vmatprep.subr.bf16.mxu1 %v3289_v13  ;;  %vm3290_vm0 = vmmov 0   ;;  %v3291_v20 = vmov 0.0   ;;  %v3292_v38 = vmov 1.0  }
  0x15   :  { %52 = vperm.xlu0 %3107, %v47_v1   ;;  %v48_v6 = vld [vmem:[%s3658_s0 + $0x8] sm:$0xff]  ;;  %v2914_v7 = vpack.c.bf16 %v64_v3, %v63_v2  ;;  %v2918_v8 = vpack.c.bf16 %v66_v5, %v65_v4  ;;  %v67_v9 = vld [vmem:[#allocation3 + $0x20] sm:$0xff]  ;;  %v68_v10 = vld [vmem:[#allocation3 + $0x28] sm:$0xff]  ;;  %2647 = vmatprep.mubr.msk.f32.mxu1 %vm3290_vm0, %v3291_v20  ;;  %v50_v36 = vand.u32 127, %v43_v35  ;;  %s3293_s0 = smov 64   ;;  %s3294_s1 = smov 32  }
  0x16   :  { %v2922_v11 = vpack.c.bf16 %v68_v10, %v67_v9  ;;  %v69_v12 = vld [vmem:[#allocation3 + $0x30] sm:$0xff]  ;;  %v26_v14 = vld [vmem:[#allocation3 + $0x80] sm:$0xff]  ;;  %v27_v15 = vld [vmem:[#allocation3 + $0x88] sm:$0xff]  ;;  %vm157_vm3 = vcmask 261120   ;;  %v3392_v10 = vshrl.u32 %v43_v35, 7  ;;  %s3295_s27 = smov [#allocation6]  }
  0x17   :  { %2915 = vmatprep.subr.bf16.mxu0 %v2914_v7  ;;  %v70_v16 = vld [vmem:[#allocation3 + $0x38] sm:$0xff]  ;;  %v3330_v17 = vpack.c.bf16 %v27_v15, %v26_v14  ;;  %v28_v18 = vld [vmem:[#allocation3 + $0x90] sm:$0xff]  ;;  %v71_v23 = vld [vmem:[#allocation3 + $0x40] sm:$0xff]  ;;  %s2409_s28 = sshll.u32 %s3295_s27, 4  ;;  %s2410_s28 = int_to_ptr.vmem [resolvable:$true] %s2409_s28 }
  0x18   :  { %2917 = vmatpush3.bf16.msra.mxu0 %v2914_v7  ;;  %v29_v19 = vld [vmem:[#allocation3 + $0x98] sm:$0xff]  ;;  %v2926_v22 = vpack.c.bf16 %v70_v16, %v69_v12  ;;  %v72_v24 = vld [vmem:[#allocation3 + $0x48] sm:$0xff]  ;;  %v73_v26 = vld [vmem:[#allocation3 + $0x50] sm:$0xff]  ;;  %s3259_s29 = scalar_lea.vmem %s2410_s28, 32  ;;  %p3264_p9 = scmp.lt.s32.totalorder %s2410_s28, %s2410_s28 }
  0x19   :  { %55 = vperm.xlu0 %3107, %v48_v6   ;;  %2919 = vmatprep.subr.bf16.mxu0 %v2918_v8  ;;  %v3335_v21 = vpack.c.bf16 %v29_v19, %v28_v18  ;;  %v2930_v25 = vpack.c.bf16 %v72_v24, %v71_v23  ;;  %v74_v27 = vld [vmem:[#allocation3 + $0x58] sm:$0xff]  ;;  %v75_v29 = vld [vmem:[#allocation3 + $0x60] sm:$0xff]  ;;  %v76_v30 = vld [vmem:[#allocation3 + $0x68] sm:$0xff]  ;;  %p3260_p8 = scmp.ne.s32.totalorder %s2410_s28, %s3259_s29  ;;  %p3265_p10 = scmp.lt.s32.totalorder %s3259_s29, %s3259_s29 }
  0x1a   :  { %2948 = vmatpush3.bf16.msra.mxu1 %v3330_v17  ;;  %v2934_v28 = vpack.c.bf16 %v74_v27, %v73_v26  ;;  %v2938_v31 = vpack.c.bf16 %v76_v30, %v75_v29  ;;  %v77_v32 = vld [vmem:[#allocation3 + $0x70] sm:$0xff]  ;;  %v78_v33 = vld [vmem:[#allocation3 + $0x78] sm:$0xff]  ;;  %v34_v56 = vld [vmem:[#allocation3 + $0xc0] sm:$0xff] }
  0x1b   :  { %2949 = vmatprep.subr.bf16.mxu1 %v3289_v13  ;;  %v2942_v34 = vpack.c.bf16 %v78_v33, %v77_v32  ;;  %v35_v57 = vld [vmem:[#allocation3 + $0xc8] sm:$0xff]  ;;  %v36_v58 = vld [vmem:[#allocation3 + $0xd0] sm:$0xff]  ;;  %v37_v60 = vld [vmem:[#allocation3 + $0xd8] sm:$0xff]  ;;  %p3266_p11 = por %p3265_p10, %p3264_p9 }
  0x1c   :  { %2921 = vmatpush3.bf16.msra.mxu0 %v2918_v8  ;;  %v3352_v59 = vpack.c.bf16 %v35_v57, %v34_v56  ;;  %v3355_v61 = vpack.c.bf16 %v37_v60, %v36_v58  ;;  %v30_v62 = vld [vmem:[#allocation3 + $0xa0] sm:$0xff]  ;;  %v31_v63 = vld [vmem:[#allocation3 + $0xa8] sm:$0xff]  ;;  %v32_v1 = vld [vmem:[#allocation3 + $0xb0] sm:$0xff] }
  0x1d   :  { %2923 = vmatprep.subr.bf16.mxu0 %v2922_v11  ;;  %v3361_v0 = vpack.c.bf16 %v31_v63, %v30_v62  ;;  %v33_v2 = vld [vmem:[#allocation3 + $0xb8] sm:$0xff]  ;;  %v42_v12 = vld [vmem:[#allocation3 + $0x100] sm:$0xff]  ;;  %p3267_p12 = pnand %p3266_p11, %p3260_p8 }
  0x1e   :  { %2951 = vmatpush3.bf16.msra.mxu1 %v3335_v21  ;;  %v3369_v4 = vpack.c.bf16 %v33_v2, %v32_v1 }
  0x1f   :  { %2952 = vmatprep.subr.bf16.mxu1 %v3289_v13 }
  0x20   :  { %2925 = vmatpush3.bf16.msra.mxu0 %v2922_v11  ;;  %v45_v11 = vsub.s32 0, %v3392_v10 }
  0x21   :  { %2927 = vmatprep.subr.bf16.mxu0 %v2926_v22  ;;  %2648 = vmatmul.mubr.f32.vlgmr.msra.gmra.mrb[0].mxu1 %v3291_v20 }
  0x22   :  { %2658 = vmatprep.mubr.msk.f32.mxu1 %vm3290_vm0, %v3291_v20  ;;  %2954 = vmatpush3.bf16.msra.mxu1 %v3352_v59  ;;  %v3395_v14 = vrot.slane %v42_v12, %v45_v11 }
  0x23   :  { %2955 = vmatprep.subr.bf16.mxu1 %v3289_v13 }
  0x24   :  { %2929 = vmatpush3.bf16.msra.mxu0 %v2926_v22 }
  0x25   :  { %2931 = vmatprep.subr.bf16.mxu0 %v2930_v25 }
  0x26   :  { %2957 = vmatpush3.bf16.msra.mxu1 %v3355_v61 }
  0x27   :  { %2958 = vmatprep.subr.bf16.mxu1 %v3289_v13 }
  0x28   :  { %2933 = vmatpush3.bf16.msra.mxu0 %v2930_v25 }
  0x29   :  { %2935 = vmatprep.subr.bf16.mxu0 %v2934_v28  ;;  %2659 = vmatmul.mubr.f32.vlgmr.msra.gmra.mrb[2].mxu1 %v3291_v20 }
  0x2a   :  { %2960 = vmatpush3.bf16.msra.mxu1 %v3361_v0  ;;  %2669 = vmatprep.mubr.msk.f32.mxu1 %vm3290_vm0, %v3291_v20 }
  0x2b   :  { %2961 = vmatprep.subr.bf16.mxu1 %v3289_v13 }
  0x2c   :  { %2937 = vmatpush3.bf16.msra.mxu0 %v2934_v28 }
  0x2d   :  { %2939 = vmatprep.subr.bf16.mxu0 %v2938_v31 }
  0x2e   :  { %2963 = vmatpush3.bf16.msra.mxu1 %v3369_v4 }
  0x2f   :  { %2964 = vmatprep.subr.bf16.mxu1 %v3289_v13 }
  0x30   :  { %2941 = vmatpush3.bf16.msra.mxu0 %v2938_v31 }
  0x31   :  { %2943 = vmatprep.subr.bf16.mxu0 %v2942_v34 }
  0x34   :  { %2945 = vmatpush3.bf16.msra.mxu0 %v2942_v34 }
  0x35   :  { %2970 = vmatprep.subr.bf16.mxu0 %v3289_v13 }
  0x94   :  { %v53_v37 = vpop.permute.xlu0 %52 }
  0x95   :  { %vm57_vm1 = vcmp.eq.s32.totalorder %v50_v36, %v53_v37 }
  0x96   :  { %2636 = vmatprep.mubr.msk.f32.mxu0 %vm57_vm1, %v3292_v38 }
  0x98   :  { %v56_v39 = vpop.permute.xlu0 %55 }
  0x99   :  { %vm58_vm2 = vcmp.eq.s32.totalorder %v50_v36, %v56_v39 }
  0x9a   :  { %2637 = vmatmul.mubr.msk.f32.vlgmr.msra.gmra.mrb[0].mxu0 %vm58_vm2, %v3292_v38 }
  0x9b   :  { %2691 = vmatprep.mubr.msk.f32.mxu0 %vm3290_vm0, %v3291_v20  ;;  %2972 = vmatpush3.bf16.msra.mxu0 %v3352_v59 }
  0x9c   :  { %2973 = vmatprep.subr.bf16.mxu0 %v3289_v13 }
  0x9f   :  { %2975 = vmatpush3.bf16.msra.mxu0 %v3355_v61 }
  0xa0   :  { %2982 = vmatprep.subr.bf16.mxu0 %v3289_v13 }
  0xf4   :  { %v227_v40 = vpop.f32.mrb[0].mxu1 }
  0xf5   :  { %v2649_v41 = vpop.f32.mrb[1].mxu1 }
  0xfc   :  { %v322_v7 = vpop.f32.mrb[2].mxu1 }
  0xfd   :  { %v2660_v8 = vpop.f32.mrb[3].mxu1 }
 0x16d   :  { %v2638_v42 = vpop.f32.mrb[0].mxu0 }
 0x16e   :  { %155 = vst [vmem:[#allocation2 + $0x8] sm:$0xff] %v2638_v42  ;;  %v145_v43 = vpop.f32.mrb[1].mxu0 }
 0x16f   :  { %154 = vst [vmem:[#allocation2] sm:$0xff] %v145_v43 }
 0x176   :  { %v156_v44 = vld [vmem:[#allocation2] sm:$0x3]  ;;  %v426_v22 = vld [vmem:[#allocation2 + $0x2] sm:$0x3]  ;;  %v697_v60 = vld [vmem:[#allocation2 + $0x4] sm:$0x3] }
 0x177   :  { %v231_v45 = vadd.f32 %v227_v40, %v156_v44 }
 0x179   :  { %3108 = vtanh.f32 %v231_v45  ;;  %v2422_v47 = vmul.f32 -1.442695, %v231_v45 }
 0x17b   :  { %3110 = vpow2.f32 %v2422_v47 }
 0x183   :  { %v3109_v46 = vpop.eup %3108 }
 0x184   :  { %241 = vrot.lane.b32.xlu1 %v3109_v46, %s3293_s0 }
 0x185   :  { %v3111_v48 = vpop.eup %3110 }
 0x186   :  { %v235_v49 = vadd.f32 1.0, %v3111_v48 }
 0x188   :  { %3112 = vrcp.f32 %v235_v49 }
 0x192   :  { %v3113_v50 = vpop.eup %3112 }
 0x193   :  { %v239_v53 = vmul.f32 0.0, %v3113_v50 }
 0x1f6   :  { %v242_v51 = vpop.permute.xlu1 %241 }
 0x1f7   :  { %v244_v52 = vmul.f32 %v3113_v50, %v242_v51 }
 0x1f9   :  { %246 = vrot.lane.b32.xlu1 %v244_v52, %s3294_s1 }
 0x26b   :  { %v247_v54 = vpop.permute.xlu1 %246 }
 0x26c   :  { %v3349_v55 = vadd.f32 %v247_v54, %v239_v53 }
 0x26e   :  { %3114 = vtanh.f32 %v3349_v55 }
 0x278   :  { %v3115_v3 = vpop.eup %3114 }
 0x279   :  { %252 = vrot.lane.b32.xlu0 %v3115_v3, %s3293_s0 }
 0x2eb   :  { %v253_v5 = vpop.permute.xlu0 %252 }
 0x2ec   :  { %v255_v6 = vmul.f32 %v3113_v50, %v253_v5 }
 0x2ee   :  { %327 = vrot.lane.b32.xlu1 %v255_v6, %s3294_s1 }
 0x360   :  { %v328_v9 = vpop.permute.xlu1 %327 }
 0x361   :  { %2670 = vmatmul.mubr.msk.f32.vlgmr.msra.gmra.mrb[4].mxu1 %vm157_vm3, %v328_v9 }
 0x362   :  { %2966 = vmatpush3.bf16.msra.mxu1 %v3330_v17  ;;  %2680 = vmatprep.mubr.msk.f32.mxu1 %vm3290_vm0, %v3291_v20 }
 0x363   :  { %2967 = vmatprep.subr.bf16.mxu1 %v3289_v13 }
 0x366   :  { %2969 = vmatpush3.bf16.msra.mxu1 %v3335_v21 }
 0x367   :  { %2976 = vmatprep.subr.bf16.mxu1 %v3289_v13 }
 0x369   :  { %2681 = vmatmul.mubr.msk.f32.vlgmr.msra.gmra.mrb[6].mxu1 %vm157_vm3, %v328_v9 }
 0x36a   :  { %2978 = vmatpush3.bf16.msra.mxu1 %v3361_v0  ;;  %2702 = vmatprep.mubr.msk.f32.mxu1 %vm3290_vm0, %v3291_v20 }
 0x36b   :  { %2979 = vmatprep.subr.bf16.mxu1 %v3289_v13 }
 0x36e   :  { %2981 = vmatpush3.bf16.msra.mxu1 %v3369_v4 }
 0x36f   :  { %2988 = vmatprep.subr.bf16.mxu1 %v3289_v13 }
 0x434   :  { %v397_v15 = vpop.f32.mrb[4].mxu1 }
 0x435   :  { %v398_v16 = vadd.f32 %v397_v15, %v322_v7  ;;  %v2671_v18 = vpop.f32.mrb[5].mxu1 }
 0x437   :  { %v401_v19 = vadd.f32 %v398_v16, %v3395_v14 }
 0x439   :  { %3116 = vtanh.f32 %v401_v19  ;;  %v2424_v28 = vmul.f32 -1.442695, %v401_v19 }
 0x43c   :  { %v493_v23 = vpop.f32.mrb[6].mxu1 }
 0x43d   :  { %v497_v24 = vadd.f32 %v493_v23, %v426_v22  ;;  %v2682_v25 = vpop.f32.mrb[7].mxu1 }
 0x43f   :  { %3118 = vtanh.f32 %v497_v24  ;;  %v2426_v29 = vmul.f32 -1.442695, %v497_v24 }
 0x440   :  { %3120 = vpow2.f32 %v2424_v28 }
 0x441   :  { %3122 = vpow2.f32 %v2426_v29 }
 0x443   :  { %v3117_v26 = vpop.eup %3116 }
 0x444   :  { %411 = vrot.lane.b32.xlu0 %v3117_v26, %s3293_s0 }
 0x449   :  { %v3119_v27 = vpop.eup %3118 }
 0x44a   :  { %507 = vrot.lane.b32.xlu1 %v3119_v27, %s3293_s0  ;;  %v3121_v30 = vpop.eup %3120 }
 0x44b   :  { %v405_v31 = vadd.f32 1.0, %v3121_v30  ;;  %v3123_v32 = vpop.eup %3122 }
 0x44c   :  { %v501_v33 = vadd.f32 1.0, %v3123_v32 }
 0x44d   :  { %3124 = vrcp.f32 %v405_v31 }
 0x44e   :  { %3126 = vrcp.f32 %v501_v33 }
 0x457   :  { %v3125_v34 = vpop.eup %3124 }
 0x458   :  { %v3127_v37 = vpop.eup %3126  ;;  %v409_v40 = vmul.f32 0.0, %v3125_v34 }
 0x459   :  { %v505_v43 = vmul.f32 %v3127_v37, %v3349_v55 }
 0x4b6   :  { %v412_v35 = vpop.permute.xlu0 %411 }
 0x4b7   :  { %v414_v36 = vmul.f32 %v3125_v34, %v412_v35 }
 0x4b9   :  { %416 = vrot.lane.b32.xlu0 %v414_v36, %s3294_s1 }
 0x4bc   :  { %v508_v38 = vpop.permute.xlu1 %507 }
 0x4bd   :  { %v510_v39 = vmul.f32 %v3127_v37, %v508_v38 }
 0x4bf   :  { %512 = vrot.lane.b32.xlu1 %v510_v39, %s3294_s1 }
 0x52b   :  { %v417_v41 = vpop.permute.xlu0 %416 }
 0x52c   :  { %v3402_v42 = vadd.f32 %v417_v41, %v409_v40 }
 0x52e   :  { %3128 = vtanh.f32 %v3402_v42 }
 0x531   :  { %v513_v44 = vpop.permute.xlu1 %512 }
 0x532   :  { %v3406_v45 = vadd.f32 %v513_v44, %v505_v43  ;;  %v968_v44 = vld [vmem:[#allocation2 + $0x6] sm:$0x3] }
 0x534   :  { %3130 = vtanh.f32 %v3406_v45 }
 0x538   :  { %v3129_v46 = vpop.eup %3128 }
 0x539   :  { %422 = vrot.lane.b32.xlu0 %v3129_v46, %s3293_s0 }
 0x53e   :  { %v3131_v47 = vpop.eup %3130 }
 0x53f   :  { %518 = vrot.lane.b32.xlu1 %v3131_v47, %s3293_s0 }
 0x5ab   :  { %v423_v48 = vpop.permute.xlu0 %422 }
 0x5ac   :  { %v425_v49 = vmul.f32 %v3125_v34, %v423_v48 }
 0x5ae   :  { %523 = vrot.lane.b32.xlu0 %v425_v49, %s3294_s1 }
 0x5b1   :  { %v519_v50 = vpop.permute.xlu1 %518 }
 0x5b2   :  { %v521_v51 = vmul.f32 %v3127_v37, %v519_v50 }
 0x5b4   :  { %598 = vrot.lane.b32.xlu1 %v521_v51, %s3294_s1 }
 0x620   :  { %v524_v52 = vpop.permute.xlu0 %523 }
 0x621   :  { %2692 = vmatmul.mubr.msk.f32.vlgmr.msra.gmra.mrb[2].mxu0 %vm157_vm3, %v524_v52 }
 0x622   :  { %2984 = vmatpush3.bf16.msra.mxu0 %v3330_v17  ;;  %2713 = vmatprep.mubr.msk.f32.mxu0 %vm3290_vm0, %v3291_v20 }
 0x623   :  { %2985 = vmatprep.subr.bf16.mxu0 %v3289_v13 }
 0x626   :  { %2987 = vmatpush3.bf16.msra.mxu0 %v3335_v21  ;;  %v599_v53 = vpop.permute.xlu1 %598 }
 0x627   :  { %2703 = vmatmul.mubr.msk.f32.vlgmr.msra.gmra.mrb[8].mxu1 %vm157_vm3, %v599_v53  ;;  %2994 = vmatprep.subr.bf16.mxu0 %v3289_v13 }
 0x628   :  { %2990 = vmatpush3.bf16.msra.mxu1 %v3352_v59  ;;  %2724 = vmatprep.mubr.msk.f32.mxu1 %vm3290_vm0, %v3291_v20 }
 0x629   :  { %2714 = vmatmul.mubr.msk.f32.vlgmr.msra.gmra.mrb[4].mxu0 %vm157_vm3, %v599_v53  ;;  %2991 = vmatprep.subr.bf16.mxu1 %v3289_v13 }
 0x62a   :  { %2996 = vmatpush3.bf16.msra.mxu0 %v3361_v0  ;;  %2735 = vmatprep.mubr.msk.f32.mxu0 %vm3290_vm0, %v3291_v20 }
 0x62b   :  { %2997 = vmatprep.subr.bf16.mxu0 %v3289_v13 }
 0x62c   :  { %2993 = vmatpush3.bf16.msra.mxu1 %v3355_v61 }
 0x62d   :  { %3000 = vmatprep.subr.bf16.mxu1 %v3289_v13 }
 0x62e   :  { %2999 = vmatpush3.bf16.msra.mxu0 %v3369_v4 }
 0x62f   :  { %3006 = vmatprep.subr.bf16.mxu0 %v3289_v13 }
 0x6f4   :  { %v593_v54 = vpop.f32.mrb[2].mxu0 }
 0x6f5   :  { %v2693_v55 = vpop.f32.mrb[3].mxu0 }
 0x6fa   :  { %v668_v56 = vpop.f32.mrb[8].mxu1 }
 0x6fb   :  { %v669_v57 = vadd.f32 %v668_v56, %v593_v54  ;;  %v2704_v58 = vpop.f32.mrb[9].mxu1 }
 0x6fc   :  { %v764_v62 = vpop.f32.mrb[4].mxu0 }
 0x6fd   :  { %v672_v63 = vadd.f32 %v669_v57, %v3395_v14  ;;  %v768_v1 = vadd.f32 %v764_v62, %v697_v60  ;;  %v2715_v2 = vpop.f32.mrb[5].mxu0 }
 0x6ff   :  { %3132 = vtanh.f32 %v672_v63  ;;  %v2429_v6 = vmul.f32 -1.442695, %v672_v63  ;;  %v2431_v7 = vmul.f32 -1.442695, %v768_v1 }
 0x700   :  { %3134 = vtanh.f32 %v768_v1 }
 0x701   :  { %3136 = vpow2.f32 %v2429_v6 }
 0x702   :  { %3138 = vpow2.f32 %v2431_v7 }
 0x709   :  { %v3133_v3 = vpop.eup %3132 }
 0x70a   :  { %v3135_v5 = vpop.eup %3134  ;;  %682 = vrot.lane.b32.xlu0 %v3133_v3, %s3293_s0 }
 0x70b   :  { %778 = vrot.lane.b32.xlu1 %v3135_v5, %s3293_s0  ;;  %v3137_v8 = vpop.eup %3136 }
 0x70c   :  { %v3139_v9 = vpop.eup %3138  ;;  %v676_v11 = vadd.f32 1.0, %v3137_v8 }
 0x70d   :  { %v772_v12 = vadd.f32 1.0, %v3139_v9 }
 0x70e   :  { %3140 = vrcp.f32 %v676_v11 }
 0x70f   :  { %3142 = vrcp.f32 %v772_v12 }
 0x718   :  { %v3141_v15 = vpop.eup %3140 }
 0x719   :  { %v3143_v18 = vpop.eup %3142  ;;  %v680_v24 = vmul.f32 %v3141_v15, %v3402_v42 }
 0x71a   :  { %v776_v25 = vmul.f32 %v3143_v18, %v3406_v45 }
 0x77c   :  { %v683_v16 = vpop.permute.xlu0 %682 }
 0x77d   :  { %v779_v19 = vpop.permute.xlu1 %778  ;;  %v685_v22 = vmul.f32 %v3141_v15, %v683_v16 }
 0x77e   :  { %v781_v23 = vmul.f32 %v3143_v18, %v779_v19 }
 0x77f   :  { %687 = vrot.lane.b32.xlu0 %v685_v22, %s3294_s1 }
 0x780   :  { %783 = vrot.lane.b32.xlu1 %v781_v23, %s3294_s1 }
 0x7f1   :  { %v688_v26 = vpop.permute.xlu0 %687 }
 0x7f2   :  { %v784_v27 = vpop.permute.xlu1 %783  ;;  %v3441_v28 = vadd.f32 %v688_v26, %v680_v24 }
 0x7f3   :  { %v3443_v29 = vadd.f32 %v784_v27, %v776_v25 }
 0x7f4   :  { %3144 = vtanh.f32 %v3441_v28 }
 0x7f5   :  { %3146 = vtanh.f32 %v3443_v29 }
 0x7fe   :  { %v3145_v30 = vpop.eup %3144 }
 0x7ff   :  { %v3147_v31 = vpop.eup %3146  ;;  %693 = vrot.lane.b32.xlu0 %v3145_v30, %s3293_s0 }
 0x800   :  { %789 = vrot.lane.b32.xlu1 %v3147_v31, %s3293_s0 }
 0x871   :  { %v694_v32 = vpop.permute.xlu0 %693 }
 0x872   :  { %v790_v33 = vpop.permute.xlu1 %789  ;;  %v696_v34 = vmul.f32 %v3141_v15, %v694_v32 }
 0x873   :  { %v792_v35 = vmul.f32 %v3143_v18, %v790_v33 }
 0x874   :  { %794 = vrot.lane.b32.xlu0 %v696_v34, %s3294_s1 }
 0x875   :  { %869 = vrot.lane.b32.xlu1 %v792_v35, %s3294_s1 }
 0x8e6   :  { %v795_v36 = vpop.permute.xlu0 %794 }
 0x8e7   :  { %v870_v37 = vpop.permute.xlu1 %869  ;;  %2725 = vmatmul.mubr.msk.f32.vlgmr.msra.gmra.mrb[10].mxu1 %vm157_vm3, %v795_v36 }
 0x8e8   :  { %2736 = vmatmul.mubr.msk.f32.vlgmr.msra.gmra.mrb[6].mxu0 %vm157_vm3, %v870_v37  ;;  %3002 = vmatpush3.bf16.msra.mxu1 %v3330_v17 }
 0x8e9   :  { %3003 = vmatprep.subr.bf16.mxu1 %v3289_v13  ;;  %2746 = vmatprep.mubr.msk.f32.mxu1 %vm3290_vm0, %v3291_v20 }
 0x8ea   :  { %3008 = vmatpush3.bf16.msra.mxu0 %v3352_v59  ;;  %2757 = vmatprep.mubr.msk.f32.mxu0 %vm3290_vm0, %v3291_v20 }
 0x8eb   :  { %3009 = vmatprep.subr.bf16.mxu0 %v3289_v13 }
 0x8ec   :  { %3005 = vmatpush3.bf16.msra.mxu1 %v3335_v21 }
 0x8ed   :  { %3012 = vmatprep.subr.bf16.mxu1 %v3289_v13 }
 0x8ee   :  { %3011 = vmatpush3.bf16.msra.mxu0 %v3355_v61 }
 0x8ef   :  { %2747 = vmatmul.mubr.msk.f32.vlgmr.msra.gmra.mrb[12].mxu1 %vm157_vm3, %v870_v37  ;;  %3018 = vmatprep.subr.bf16.mxu0 %v3289_v13 }
 0x8f0   :  { %3014 = vmatpush3.bf16.msra.mxu1 %v3361_v0  ;;  %2768 = vmatprep.mubr.msk.f32.mxu1 %vm3290_vm0, %v3291_v20 }
 0x8f1   :  { %3015 = vmatprep.subr.bf16.mxu1 %v3289_v13 }
 0x8f4   :  { %3017 = vmatpush3.bf16.msra.mxu1 %v3369_v4 }
 0x8f5   :  { %3024 = vmatprep.subr.bf16.mxu1 %v3289_v13 }
 0x9ba   :  { %v864_v38 = vpop.f32.mrb[10].mxu1 }
 0x9bb   :  { %v939_v39 = vpop.f32.mrb[6].mxu0  ;;  %v2726_v40 = vpop.f32.mrb[11].mxu1 }
 0x9bc   :  { %v940_v41 = vadd.f32 %v939_v39, %v864_v38  ;;  %v2737_v42 = vpop.f32.mrb[7].mxu0 }
 0x9be   :  { %v943_v43 = vadd.f32 %v940_v41, %v3395_v14 }
 0x9c0   :  { %3148 = vtanh.f32 %v943_v43  ;;  %v2434_v50 = vmul.f32 -1.442695, %v943_v43 }
 0x9c2   :  { %v1035_v45 = vpop.f32.mrb[12].mxu1 }
 0x9c3   :  { %v1039_v46 = vadd.f32 %v1035_v45, %v968_v44  ;;  %v2748_v47 = vpop.f32.mrb[13].mxu1 }
 0x9c5   :  { %3150 = vtanh.f32 %v1039_v46  ;;  %v2436_v51 = vmul.f32 -1.442695, %v1039_v46 }
 0x9c6   :  { %3152 = vpow2.f32 %v2434_v50 }
 0x9c7   :  { %3154 = vpow2.f32 %v2436_v51 }
 0x9ca   :  { %v3149_v48 = vpop.eup %3148 }
 0x9cb   :  { %953 = vrot.lane.b32.xlu0 %v3149_v48, %s3293_s0 }
 0x9cf   :  { %v3151_v49 = vpop.eup %3150 }
 0x9d0   :  { %1049 = vrot.lane.b32.xlu1 %v3151_v49, %s3293_s0  ;;  %v3153_v52 = vpop.eup %3152 }
 0x9d1   :  { %v947_v53 = vadd.f32 1.0, %v3153_v52  ;;  %v3155_v54 = vpop.eup %3154 }
 0x9d2   :  { %v1043_v55 = vadd.f32 1.0, %v3155_v54 }
 0x9d3   :  { %3156 = vrcp.f32 %v947_v53 }
 0x9d4   :  { %3158 = vrcp.f32 %v1043_v55 }
 0x9dd   :  { %v3157_v56 = vpop.eup %3156 }
 0x9de   :  { %v3159_v60 = vpop.eup %3158  ;;  %v951_v1 = vmul.f32 %v3157_v56, %v3441_v28  ;;  %v1239_v28 = vld [vmem:[#allocation2 + $0x8] sm:$0x3] }
 0x9df   :  { %v1047_v5 = vmul.f32 %v3159_v60, %v3443_v29 }
 0xa3d   :  { %v954_v57 = vpop.permute.xlu0 %953 }
 0xa3e   :  { %v956_v58 = vmul.f32 %v3157_v56, %v954_v57 }
 0xa40   :  { %958 = vrot.lane.b32.xlu0 %v956_v58, %s3294_s1 }
 0xa42   :  { %v1050_v62 = vpop.permute.xlu1 %1049 }
 0xa43   :  { %v1052_v63 = vmul.f32 %v3159_v60, %v1050_v62 }
 0xa45   :  { %1054 = vrot.lane.b32.xlu1 %v1052_v63, %s3294_s1 }
 0xab2   :  { %v959_v2 = vpop.permute.xlu0 %958 }
 0xab3   :  { %v3478_v3 = vadd.f32 %v959_v2, %v951_v1 }
 0xab5   :  { %3160 = vtanh.f32 %v3478_v3 }
 0xab7   :  { %v1055_v6 = vpop.permute.xlu1 %1054 }
 0xab8   :  { %v3482_v7 = vadd.f32 %v1055_v6, %v1047_v5  ;;  %v1510_v6 = vld [vmem:[#allocation2 + $0xa] sm:$0x3] }
 0xaba   :  { %3162 = vtanh.f32 %v3482_v7 }
 0xabf   :  { %v3161_v8 = vpop.eup %3160 }
 0xac0   :  { %964 = vrot.lane.b32.xlu0 %v3161_v8, %s3293_s0 }
 0xac4   :  { %v3163_v9 = vpop.eup %3162 }
 0xac5   :  { %1060 = vrot.lane.b32.xlu1 %v3163_v9, %s3293_s0 }
 0xb32   :  { %v965_v11 = vpop.permute.xlu0 %964 }
 0xb33   :  { %v967_v12 = vmul.f32 %v3157_v56, %v965_v11 }
 0xb35   :  { %1065 = vrot.lane.b32.xlu0 %v967_v12, %s3294_s1 }
 0xb37   :  { %v1061_v15 = vpop.permute.xlu1 %1060 }
 0xb38   :  { %v1063_v16 = vmul.f32 %v3159_v60, %v1061_v15 }
 0xb3a   :  { %1140 = vrot.lane.b32.xlu1 %v1063_v16, %s3294_s1 }
 0xba7   :  { %v1066_v18 = vpop.permute.xlu0 %1065 }
 0xba8   :  { %2758 = vmatmul.mubr.msk.f32.vlgmr.msra.gmra.mrb[8].mxu0 %vm157_vm3, %v1066_v18 }
 0xba9   :  { %3020 = vmatpush3.bf16.msra.mxu0 %v3330_v17  ;;  %2779 = vmatprep.mubr.msk.f32.mxu0 %vm3290_vm0, %v3291_v20 }
 0xbaa   :  { %3021 = vmatprep.subr.bf16.mxu0 %v3289_v13 }
 0xbac   :  { %v1141_v19 = vpop.permute.xlu1 %1140 }
 0xbad   :  { %3023 = vmatpush3.bf16.msra.mxu0 %v3335_v21  ;;  %2769 = vmatmul.mubr.msk.f32.vlgmr.msra.gmra.mrb[14].mxu1 %vm157_vm3, %v1141_v19 }
 0xbae   :  { %3026 = vmatpush3.bf16.msra.mxu1 %v3352_v59  ;;  %3030 = vmatprep.subr.bf16.mxu0 %v3289_v13 }
 0xbaf   :  { %3027 = vmatprep.subr.bf16.mxu1 %v3289_v13  ;;  %2790 = vmatprep.mubr.msk.f32.mxu1 %vm3290_vm0, %v3291_v20 }
 0xbb0   :  { %2780 = vmatmul.mubr.msk.f32.vlgmr.msra.gmra.mrb[10].mxu0 %vm157_vm3, %v1141_v19 }
 0xbb1   :  { %3032 = vmatpush3.bf16.msra.mxu0 %v3361_v0  ;;  %2801 = vmatprep.mubr.msk.f32.mxu0 %vm3290_vm0, %v3291_v20 }
 0xbb2   :  { %3029 = vmatpush3.bf16.msra.mxu1 %v3355_v61  ;;  %3033 = vmatprep.subr.bf16.mxu0 %v3289_v13 }
 0xbb3   :  { %3036 = vmatprep.subr.bf16.mxu1 %v3289_v13 }
 0xbb5   :  { %3035 = vmatpush3.bf16.msra.mxu0 %v3369_v4 }
 0xbb6   :  { %3042 = vmatprep.subr.bf16.mxu0 %v3289_v13 }
 0xc7b   :  { %v1135_v22 = vpop.f32.mrb[8].mxu0 }
 0xc7c   :  { %v2759_v23 = vpop.f32.mrb[9].mxu0 }
 0xc80   :  { %v1210_v24 = vpop.f32.mrb[14].mxu1 }
 0xc81   :  { %v1211_v25 = vadd.f32 %v1210_v24, %v1135_v22  ;;  %v2770_v26 = vpop.f32.mrb[15].mxu1 }
 0xc83   :  { %v1214_v27 = vadd.f32 %v1211_v25, %v3395_v14  ;;  %v1306_v29 = vpop.f32.mrb[10].mxu0 }
 0xc84   :  { %v1310_v30 = vadd.f32 %v1306_v29, %v1239_v28  ;;  %v2781_v31 = vpop.f32.mrb[11].mxu0 }
 0xc85   :  { %3164 = vtanh.f32 %v1214_v27  ;;  %v2439_v34 = vmul.f32 -1.442695, %v1214_v27 }
 0xc86   :  { %3166 = vtanh.f32 %v1310_v30  ;;  %v2441_v35 = vmul.f32 -1.442695, %v1310_v30 }
 0xc87   :  { %3168 = vpow2.f32 %v2439_v34 }
 0xc88   :  { %3170 = vpow2.f32 %v2441_v35 }
 0xc8f   :  { %v3165_v32 = vpop.eup %3164 }
 0xc90   :  { %v3167_v33 = vpop.eup %3166  ;;  %1224 = vrot.lane.b32.xlu0 %v3165_v32, %s3293_s0 }
 0xc91   :  { %1320 = vrot.lane.b32.xlu1 %v3167_v33, %s3293_s0  ;;  %v3169_v36 = vpop.eup %3168 }
 0xc92   :  { %v3171_v37 = vpop.eup %3170  ;;  %v1218_v38 = vadd.f32 1.0, %v3169_v36 }
 0xc93   :  { %v1314_v39 = vadd.f32 1.0, %v3171_v37 }
 0xc94   :  { %3172 = vrcp.f32 %v1218_v38 }
 0xc95   :  { %3174 = vrcp.f32 %v1314_v39 }
 0xc9e   :  { %v3173_v40 = vpop.eup %3172 }
 0xc9f   :  { %v3175_v42 = vpop.eup %3174  ;;  %v1222_v46 = vmul.f32 %v3173_v40, %v3478_v3 }
 0xca0   :  { %v1318_v47 = vmul.f32 %v3175_v42, %v3482_v7 }
 0xd02   :  { %v1225_v41 = vpop.permute.xlu0 %1224 }
 0xd03   :  { %v1321_v43 = vpop.permute.xlu1 %1320  ;;  %v1227_v44 = vmul.f32 %v3173_v40, %v1225_v41 }
 0xd04   :  { %v1323_v45 = vmul.f32 %v3175_v42, %v1321_v43 }
 0xd05   :  { %1229 = vrot.lane.b32.xlu0 %v1227_v44, %s3294_s1 }
 0xd06   :  { %1325 = vrot.lane.b32.xlu1 %v1323_v45, %s3294_s1 }
 0xd77   :  { %v1230_v48 = vpop.permute.xlu0 %1229 }
 0xd78   :  { %v1326_v49 = vpop.permute.xlu1 %1325  ;;  %v3517_v50 = vadd.f32 %v1230_v48, %v1222_v46 }
 0xd79   :  { %v3519_v51 = vadd.f32 %v1326_v49, %v1318_v47 }
 0xd7a   :  { %3176 = vtanh.f32 %v3517_v50 }
 0xd7b   :  { %3178 = vtanh.f32 %v3519_v51 }
 0xd84   :  { %v3177_v52 = vpop.eup %3176 }
 0xd85   :  { %v3179_v53 = vpop.eup %3178  ;;  %1235 = vrot.lane.b32.xlu0 %v3177_v52, %s3293_s0 }
 0xd86   :  { %1331 = vrot.lane.b32.xlu1 %v3179_v53, %s3293_s0 }
 0xdf7   :  { %v1236_v54 = vpop.permute.xlu0 %1235 }
 0xdf8   :  { %v1332_v55 = vpop.permute.xlu1 %1331  ;;  %v1238_v56 = vmul.f32 %v3173_v40, %v1236_v54 }
 0xdf9   :  { %v1334_v57 = vmul.f32 %v3175_v42, %v1332_v55 }
 0xdfa   :  { %1336 = vrot.lane.b32.xlu0 %v1238_v56, %s3294_s1 }
 0xdfb   :  { %1411 = vrot.lane.b32.xlu1 %v1334_v57, %s3294_s1 }
 0xe6c   :  { %v1337_v58 = vpop.permute.xlu0 %1336 }
 0xe6d   :  { %v1412_v60 = vpop.permute.xlu1 %1411  ;;  %2791 = vmatmul.mubr.msk.f32.vlgmr.msra.gmra.mrb[16].mxu1 %vm157_vm3, %v1337_v58 }
 0xe6e   :  { %2802 = vmatmul.mubr.msk.f32.vlgmr.msra.gmra.mrb[12].mxu0 %vm157_vm3, %v1412_v60  ;;  %3038 = vmatpush3.bf16.msra.mxu1 %v3330_v17 }
 0xe6f   :  { %3039 = vmatprep.subr.bf16.mxu1 %v3289_v13  ;;  %2812 = vmatprep.mubr.msk.f32.mxu1 %vm3290_vm0, %v3291_v20 }
 0xe70   :  { %3044 = vmatpush3.bf16.msra.mxu0 %v3352_v59  ;;  %2823 = vmatprep.mubr.msk.f32.mxu0 %vm3290_vm0, %v3291_v20 }
 0xe71   :  { %3045 = vmatprep.subr.bf16.mxu0 %v3289_v13 }
 0xe72   :  { %3041 = vmatpush3.bf16.msra.mxu1 %v3335_v21 }
 0xe73   :  { %3048 = vmatprep.subr.bf16.mxu1 %v3289_v13 }
 0xe74   :  { %3047 = vmatpush3.bf16.msra.mxu0 %v3355_v61 }
 0xe75   :  { %2813 = vmatmul.mubr.msk.f32.vlgmr.msra.gmra.mrb[18].mxu1 %vm157_vm3, %v1412_v60  ;;  %3054 = vmatprep.subr.bf16.mxu0 %v3289_v13 }
 0xe76   :  { %3050 = vmatpush3.bf16.msra.mxu1 %v3361_v0  ;;  %2834 = vmatprep.mubr.msk.f32.mxu1 %vm3290_vm0, %v3291_v20 }
 0xe77   :  { %3051 = vmatprep.subr.bf16.mxu1 %v3289_v13 }
 0xe7a   :  { %3053 = vmatpush3.bf16.msra.mxu1 %v3369_v4 }
 0xe7b   :  { %3060 = vmatprep.subr.bf16.mxu1 %v3289_v13 }
 0xf40   :  { %v1406_v62 = vpop.f32.mrb[16].mxu1 }
 0xf41   :  { %v1481_v63 = vpop.f32.mrb[12].mxu0  ;;  %v2792_v1 = vpop.f32.mrb[17].mxu1 }
 0xf42   :  { %v1482_v2 = vadd.f32 %v1481_v63, %v1406_v62  ;;  %v2803_v3 = vpop.f32.mrb[13].mxu0 }
 0xf44   :  { %v1485_v5 = vadd.f32 %v1482_v2, %v3395_v14 }
 0xf46   :  { %3180 = vtanh.f32 %v1485_v5  ;;  %v2444_v15 = vmul.f32 -1.442695, %v1485_v5 }
 0xf48   :  { %v1577_v7 = vpop.f32.mrb[18].mxu1 }
 0xf49   :  { %v1581_v8 = vadd.f32 %v1577_v7, %v1510_v6  ;;  %v2814_v9 = vpop.f32.mrb[19].mxu1 }
 0xf4b   :  { %3182 = vtanh.f32 %v1581_v8  ;;  %v2446_v16 = vmul.f32 -1.442695, %v1581_v8 }
 0xf4c   :  { %3184 = vpow2.f32 %v2444_v15 }
 0xf4d   :  { %3186 = vpow2.f32 %v2446_v16 }
 0xf50   :  { %v3181_v11 = vpop.eup %3180 }
 0xf51   :  { %1495 = vrot.lane.b32.xlu0 %v3181_v11, %s3293_s0 }
 0xf55   :  { %v3183_v12 = vpop.eup %3182 }
 0xf56   :  { %1591 = vrot.lane.b32.xlu1 %v3183_v12, %s3293_s0  ;;  %v3185_v18 = vpop.eup %3184 }
 0xf57   :  { %v1489_v19 = vadd.f32 1.0, %v3185_v18  ;;  %v3187_v22 = vpop.eup %3186 }
 0xf58   :  { %v1585_v23 = vadd.f32 1.0, %v3187_v22 }
 0xf59   :  { %3188 = vrcp.f32 %v1489_v19 }
 0xf5a   :  { %3190 = vrcp.f32 %v1585_v23 }
 0xf63   :  { %v3189_v24 = vpop.eup %3188 }
 0xf64   :  { %v3191_v27 = vpop.eup %3190  ;;  %v1493_v30 = vmul.f32 %v3189_v24, %v3517_v50  ;;  %v1781_v50 = vld [vmem:[#allocation2 + $0xc] sm:$0x3] }
 0xf65   :  { %v1589_v33 = vmul.f32 %v3191_v27, %v3519_v51 }
 0xfc3   :  { %v1496_v25 = vpop.permute.xlu0 %1495 }
 0xfc4   :  { %v1498_v26 = vmul.f32 %v3189_v24, %v1496_v25 }
 0xfc6   :  { %1500 = vrot.lane.b32.xlu0 %v1498_v26, %s3294_s1 }
 0xfc8   :  { %v1592_v28 = vpop.permute.xlu1 %1591 }
 0xfc9   :  { %v1594_v29 = vmul.f32 %v3191_v27, %v1592_v28 }
 0xfcb   :  { %1596 = vrot.lane.b32.xlu1 %v1594_v29, %s3294_s1 }
0x1038   :  { %v1501_v31 = vpop.permute.xlu0 %1500 }
0x1039   :  { %v3554_v32 = vadd.f32 %v1501_v31, %v1493_v30  ;;  %v2052_v30 = vld [vmem:[#allocation2 + $0xe] sm:$0x3] }
0x103b   :  { %3192 = vtanh.f32 %v3554_v32 }
0x103d   :  { %v1597_v34 = vpop.permute.xlu1 %1596 }
0x103e   :  { %v3558_v35 = vadd.f32 %v1597_v34, %v1589_v33 }
0x1040   :  { %3194 = vtanh.f32 %v3558_v35 }
0x1045   :  { %v3193_v36 = vpop.eup %3192 }
0x1046   :  { %1506 = vrot.lane.b32.xlu0 %v3193_v36, %s3293_s0 }
0x104a   :  { %v3195_v37 = vpop.eup %3194 }
0x104b   :  { %1602 = vrot.lane.b32.xlu1 %v3195_v37, %s3293_s0 }
0x10b8   :  { %v1507_v38 = vpop.permute.xlu0 %1506 }
0x10b9   :  { %v1509_v39 = vmul.f32 %v3189_v24, %v1507_v38 }
0x10bb   :  { %1607 = vrot.lane.b32.xlu0 %v1509_v39, %s3294_s1 }
0x10bd   :  { %v1603_v40 = vpop.permute.xlu1 %1602 }
0x10be   :  { %v1605_v41 = vmul.f32 %v3191_v27, %v1603_v40 }
0x10c0   :  { %1682 = vrot.lane.b32.xlu1 %v1605_v41, %s3294_s1 }
0x112d   :  { %v1608_v42 = vpop.permute.xlu0 %1607 }
0x112e   :  { %2824 = vmatmul.mubr.msk.f32.vlgmr.msra.gmra.mrb[14].mxu0 %vm157_vm3, %v1608_v42 }
0x112f   :  { %3056 = vmatpush3.bf16.msra.mxu0 %v3330_v17  ;;  %2845 = vmatprep.mubr.msk.f32.mxu0 %vm3290_vm0, %v3291_v20 }
0x1130   :  { %3057 = vmatprep.subr.bf16.mxu0 %v3289_v13 }
0x1132   :  { %v1683_v43 = vpop.permute.xlu1 %1682 }
0x1133   :  { %3059 = vmatpush3.bf16.msra.mxu0 %v3335_v21  ;;  %2835 = vmatmul.mubr.msk.f32.vlgmr.msra.gmra.mrb[20].mxu1 %vm157_vm3, %v1683_v43 }
0x1134   :  { %3062 = vmatpush3.bf16.msra.mxu1 %v3352_v59  ;;  %3066 = vmatprep.subr.bf16.mxu0 %v3289_v13 }
0x1135   :  { %3063 = vmatprep.subr.bf16.mxu1 %v3289_v13  ;;  %2856 = vmatprep.mubr.msk.f32.mxu1 %vm3290_vm0, %v3291_v20 }
0x1136   :  { %2846 = vmatmul.mubr.msk.f32.vlgmr.msra.gmra.mrb[16].mxu0 %vm157_vm3, %v1683_v43 }
0x1137   :  { %3068 = vmatpush3.bf16.msra.mxu0 %v3361_v0  ;;  %2867 = vmatprep.mubr.msk.f32.mxu0 %vm3290_vm0, %v3291_v20 }
0x1138   :  { %3065 = vmatpush3.bf16.msra.mxu1 %v3355_v61  ;;  %3069 = vmatprep.subr.bf16.mxu0 %v3289_v13 }
0x1139   :  { %3072 = vmatprep.subr.bf16.mxu1 %v3289_v13 }
0x113b   :  { %3071 = vmatpush3.bf16.msra.mxu0 %v3369_v4 }
0x113c   :  { %3078 = vmatprep.subr.bf16.mxu0 %v3289_v13 }
0x1201   :  { %v1677_v44 = vpop.f32.mrb[14].mxu0 }
0x1202   :  { %v2825_v45 = vpop.f32.mrb[15].mxu0 }
0x1206   :  { %v1752_v46 = vpop.f32.mrb[20].mxu1 }
0x1207   :  { %v1753_v47 = vadd.f32 %v1752_v46, %v1677_v44  ;;  %v2836_v48 = vpop.f32.mrb[21].mxu1 }
0x1209   :  { %v1756_v49 = vadd.f32 %v1753_v47, %v3395_v14  ;;  %v1848_v51 = vpop.f32.mrb[16].mxu0 }
0x120a   :  { %v1852_v52 = vadd.f32 %v1848_v51, %v1781_v50  ;;  %v2847_v53 = vpop.f32.mrb[17].mxu0 }
0x120b   :  { %3196 = vtanh.f32 %v1756_v49  ;;  %v2449_v56 = vmul.f32 -1.442695, %v1756_v49 }
0x120c   :  { %3198 = vtanh.f32 %v1852_v52  ;;  %v2451_v57 = vmul.f32 -1.442695, %v1852_v52 }
0x120d   :  { %3200 = vpow2.f32 %v2449_v56 }
0x120e   :  { %3202 = vpow2.f32 %v2451_v57 }
0x1215   :  { %v3197_v54 = vpop.eup %3196 }
0x1216   :  { %v3199_v55 = vpop.eup %3198  ;;  %1766 = vrot.lane.b32.xlu0 %v3197_v54, %s3293_s0 }
0x1217   :  { %1862 = vrot.lane.b32.xlu1 %v3199_v55, %s3293_s0  ;;  %v3201_v58 = vpop.eup %3200 }
0x1218   :  { %v3203_v60 = vpop.eup %3202  ;;  %v1760_v62 = vadd.f32 1.0, %v3201_v58 }
0x1219   :  { %v1856_v63 = vadd.f32 1.0, %v3203_v60 }
0x121a   :  { %3204 = vrcp.f32 %v1760_v62 }
0x121b   :  { %3206 = vrcp.f32 %v1856_v63 }
0x1224   :  { %v3205_v1 = vpop.eup %3204 }
0x1225   :  { %v3207_v3 = vpop.eup %3206  ;;  %v1764_v8 = vmul.f32 %v3205_v1, %v3554_v32 }
0x1226   :  { %v1860_v9 = vmul.f32 %v3207_v3, %v3558_v35 }
0x1288   :  { %v1767_v2 = vpop.permute.xlu0 %1766 }
0x1289   :  { %v1863_v5 = vpop.permute.xlu1 %1862  ;;  %v1769_v6 = vmul.f32 %v3205_v1, %v1767_v2 }
0x128a   :  { %v1865_v7 = vmul.f32 %v3207_v3, %v1863_v5 }
0x128b   :  { %1771 = vrot.lane.b32.xlu0 %v1769_v6, %s3294_s1 }
0x128c   :  { %1867 = vrot.lane.b32.xlu1 %v1865_v7, %s3294_s1 }
0x12fd   :  { %v1772_v11 = vpop.permute.xlu0 %1771 }
0x12fe   :  { %v1868_v12 = vpop.permute.xlu1 %1867  ;;  %v3593_v15 = vadd.f32 %v1772_v11, %v1764_v8 }
0x12ff   :  { %v3595_v16 = vadd.f32 %v1868_v12, %v1860_v9 }
0x1300   :  { %3208 = vtanh.f32 %v3593_v15 }
0x1301   :  { %3210 = vtanh.f32 %v3595_v16 }
0x130a   :  { %v3209_v18 = vpop.eup %3208 }
0x130b   :  { %v3211_v19 = vpop.eup %3210  ;;  %1777 = vrot.lane.b32.xlu0 %v3209_v18, %s3293_s0 }
0x130c   :  { %1873 = vrot.lane.b32.xlu1 %v3211_v19, %s3293_s0  ;;  %v38_v19 = vld [vmem:[#allocation3 + $0xe0] sm:$0xff] }
0x137d   :  { %v1778_v22 = vpop.permute.xlu0 %1777 }
0x137e   :  { %v1874_v23 = vpop.permute.xlu1 %1873  ;;  %v1780_v24 = vmul.f32 %v3205_v1, %v1778_v22  ;;  %v40_v22 = vld [vmem:[#allocation3 + $0xf0] sm:$0xff] }
0x137f   :  { %v1876_v25 = vmul.f32 %v3207_v3, %v1874_v23 }
0x1380   :  { %1878 = vrot.lane.b32.xlu0 %v1780_v24, %s3294_s1  ;;  %v41_v24 = vld [vmem:[#allocation3 + $0xf8] sm:$0xff] }
0x1381   :  { %1953 = vrot.lane.b32.xlu1 %v1876_v25, %s3294_s1  ;;  %v3094_v25 = vpack.c.bf16 %v41_v24, %v40_v22 }
0x13f2   :  { %v1879_v26 = vpop.permute.xlu0 %1878 }
0x13f3   :  { %v1954_v27 = vpop.permute.xlu1 %1953  ;;  %2857 = vmatmul.mubr.msk.f32.vlgmr.msra.gmra.mrb[22].mxu1 %vm157_vm3, %v1879_v26 }
0x13f4   :  { %2868 = vmatmul.mubr.msk.f32.vlgmr.msra.gmra.mrb[18].mxu0 %vm157_vm3, %v1954_v27  ;;  %3074 = vmatpush3.bf16.msra.mxu1 %v3330_v17 }
0x13f5   :  { %3075 = vmatprep.subr.bf16.mxu1 %v3289_v13  ;;  %2878 = vmatprep.mubr.msk.f32.mxu1 %vm3290_vm0, %v3291_v20 }
0x13f6   :  { %3080 = vmatpush3.bf16.msra.mxu0 %v3352_v59  ;;  %2889 = vmatprep.mubr.msk.f32.mxu0 %vm3290_vm0, %v3291_v20 }
0x13f7   :  { %3081 = vmatprep.subr.bf16.mxu0 %v3289_v13 }
0x13f8   :  { %3077 = vmatpush3.bf16.msra.mxu1 %v3335_v21 }
0x13f9   :  { %3084 = vmatprep.subr.bf16.mxu1 %v3289_v13 }
0x13fa   :  { %3083 = vmatpush3.bf16.msra.mxu0 %v3355_v61 }
0x13fb   :  { %2879 = vmatmul.mubr.msk.f32.vlgmr.msra.gmra.mrb[24].mxu1 %vm157_vm3, %v1954_v27  ;;  %3090 = vmatprep.subr.bf16.mxu0 %v3289_v13 }
0x13fc   :  { %3086 = vmatpush3.bf16.msra.mxu1 %v3361_v0  ;;  %2900 = vmatprep.mubr.msk.f32.mxu1 %vm3290_vm0, %v3291_v20 }
0x13fd   :  { %3087 = vmatprep.subr.bf16.mxu1 %v3289_v13 }
0x1400   :  { %3089 = vmatpush3.bf16.msra.mxu1 %v3369_v4 }
0x14c6   :  { %v1948_v17 = vpop.f32.mrb[22].mxu1 }
0x14c7   :  { %v2023_v59 = vpop.f32.mrb[18].mxu0  ;;  %v2858_v21 = vpop.f32.mrb[23].mxu1 }
0x14c8   :  { %v2024_v28 = vadd.f32 %v2023_v59, %v1948_v17  ;;  %v2869_v29 = vpop.f32.mrb[19].mxu0  ;;  %v2325_v21 = vsub.s32 1, %v3392_v10 }
0x14ca   :  { %v2027_v61 = vadd.f32 %v2024_v28, %v3395_v14  ;;  %v3236_v28 = vld [vmem:[#allocation3 + $0x100] sm:$0xff] }
0x14cb   :  { %v2326_v29 = vrot.slane %v3236_v28, %v2325_v21 }
0x14cc   :  { %3212 = vtanh.f32 %v2027_v61  ;;  %v2454_v4 = vmul.f32 -1.442695, %v2027_v61 }
0x14ce   :  { %v2119_v31 = vpop.f32.mrb[24].mxu1 }
0x14cf   :  { %v2123_v32 = vadd.f32 %v2119_v31, %v2052_v30  ;;  %v2880_v33 = vpop.f32.mrb[25].mxu1 }
0x14d1   :  { %3214 = vtanh.f32 %v2123_v32  ;;  %v2456_v35 = vmul.f32 -1.442695, %v2123_v32 }
0x14d2   :  { %3216 = vpow2.f32 %v2454_v4 }
0x14d3   :  { %3218 = vpow2.f32 %v2456_v35 }
0x14d6   :  { %v3213_v0 = vpop.eup %3212 }
0x14d7   :  { %2037 = vrot.lane.b32.xlu0 %v3213_v0, %s3293_s0 }
0x14db   :  { %v3215_v34 = vpop.eup %3214 }
0x14dc   :  { %2133 = vrot.lane.b32.xlu1 %v3215_v34, %s3293_s0  ;;  %v3217_v36 = vpop.eup %3216 }
0x14dd   :  { %v2031_v37 = vadd.f32 1.0, %v3217_v36  ;;  %v3219_v38 = vpop.eup %3218 }
0x14de   :  { %v2127_v39 = vadd.f32 1.0, %v3219_v38 }
0x14df   :  { %3220 = vrcp.f32 %v2031_v37 }
0x14e0   :  { %3222 = vrcp.f32 %v2127_v39 }
0x14e9   :  { %v3221_v40 = vpop.eup %3220 }
0x14ea   :  { %v3223_v43 = vpop.eup %3222  ;;  %v2035_v46 = vmul.f32 %v3221_v40, %v3593_v15 }
0x14eb   :  { %v2131_v49 = vmul.f32 %v3223_v43, %v3595_v16 }
0x1549   :  { %v2038_v41 = vpop.permute.xlu0 %2037 }
0x154a   :  { %v2040_v42 = vmul.f32 %v3221_v40, %v2038_v41 }
0x154c   :  { %2042 = vrot.lane.b32.xlu0 %v2040_v42, %s3294_s1 }
0x154e   :  { %v2134_v44 = vpop.permute.xlu1 %2133 }
0x154f   :  { %v2136_v45 = vmul.f32 %v3223_v43, %v2134_v44 }
0x1551   :  { %2138 = vrot.lane.b32.xlu1 %v2136_v45, %s3294_s1 }
0x15be   :  { %v2043_v47 = vpop.permute.xlu0 %2042 }
0x15bf   :  { %v2045_v48 = vadd.f32 %v2043_v47, %v2035_v46 }
0x15c1   :  { %3224 = vtanh.f32 %v2045_v48 }
0x15c3   :  { %v2139_v50 = vpop.permute.xlu1 %2138 }
0x15c4   :  { %v2141_v51 = vadd.f32 %v2139_v50, %v2131_v49 }
0x15c6   :  { %3226 = vtanh.f32 %v2141_v51 }
0x15cb   :  { %v3225_v52 = vpop.eup %3224 }
0x15cc   :  { %2048 = vrot.lane.b32.xlu0 %v3225_v52, %s3293_s0 }
0x15d0   :  { %v3227_v53 = vpop.eup %3226 }
0x15d1   :  { %2144 = vrot.lane.b32.xlu1 %v3227_v53, %s3293_s0 }
0x163e   :  { %v2049_v54 = vpop.permute.xlu0 %2048 }
0x163f   :  { %v2051_v55 = vmul.f32 %v3221_v40, %v2049_v54 }
0x1641   :  { %2149 = vrot.lane.b32.xlu0 %v2051_v55, %s3294_s1 }
0x1643   :  { %v2145_v56 = vpop.permute.xlu1 %2144 }
0x1644   :  { %v2147_v57 = vmul.f32 %v3223_v43, %v2145_v56 }
0x1646   :  { %2224 = vrot.lane.b32.xlu1 %v2147_v57, %s3294_s1 }
0x16b3   :  { %v2150_v58 = vpop.permute.xlu0 %2149 }
0x16b4   :  { %2890 = vmatmul.mubr.msk.f32.vlgmr.msra.gmra.mrb[20].mxu0 %vm157_vm3, %v2150_v58 }
0x16b5   :  { %2911 = vmatprep.mubr.msk.f32.mxu0 %vm3290_vm0, %v3291_v20 }
0x16b8   :  { %v2225_v60 = vpop.permute.xlu1 %2224 }
0x16b9   :  { %2901 = vmatmul.mubr.msk.f32.vlgmr.msra.gmra.mrb[26].mxu1 %vm157_vm3, %v2225_v60 }
0x1787   :  { %v2219_v62 = vpop.f32.mrb[20].mxu0 }
0x1788   :  { %v2891_v63 = vpop.f32.mrb[21].mxu0 }
0x178c   :  { %v2294_v1 = vpop.f32.mrb[26].mxu1 }
0x178d   :  { %v2295_v2 = vadd.f32 %v2294_v1, %v2219_v62  ;;  %v2902_v3 = vpop.f32.mrb[27].mxu1 }
0x178f   :  { %v2298_v5 = vadd.f32 %v2295_v2, %v3395_v14  ;;  %v39_v14 = vld [vmem:[#allocation3 + $0xe8] sm:$0xff] }
0x1790   :  { %v3091_v23 = vpack.c.bf16 %v39_v14, %v38_v19 }
0x1791   :  { %3228 = vtanh.f32 %v2298_v5  ;;  %v2459_v7 = vmul.f32 -1.442695, %v2298_v5 }
0x1792   :  { %3092 = vmatpush3.bf16.msra.mxu0 %v3091_v23 }
0x1793   :  { %3230 = vpow2.f32 %v2459_v7  ;;  %3093 = vmatprep.subr.bf16.mxu0 %v3289_v13 }
0x1796   :  { %3095 = vmatpush3.bf16.msra.mxu0 %v3094_v25 }
0x179b   :  { %v3229_v6 = vpop.eup %3228 }
0x179c   :  { %2308 = vrot.lane.b32.xlu0 %v3229_v6, %s3293_s0 }
0x179d   :  { %v3231_v8 = vpop.eup %3230 }
0x179e   :  { %v2302_v9 = vadd.f32 1.0, %v3231_v8 }
0x17a0   :  { %3232 = vrcp.f32 %v2302_v9 }
0x17aa   :  { %v3233_v20 = vpop.eup %3232 }
0x17ab   :  { %v2306_v15 = vmul.f32 %v3233_v20, %v2045_v48 }
0x180e   :  { %v2309_v11 = vpop.permute.xlu0 %2308 }
0x180f   :  { %v2311_v12 = vmul.f32 %v3233_v20, %v2309_v11 }
0x1811   :  { %2313 = vrot.lane.b32.xlu1 %v2311_v12, %s3294_s1 }
0x1883   :  { %v2314_v16 = vpop.permute.xlu1 %2313 }
0x1884   :  { %v2316_v18 = vadd.f32 %v2314_v16, %v2306_v15 }
0x1886   :  { %3234 = vtanh.f32 %v2316_v18 }
0x1890   :  { %v3235_v26 = vpop.eup %3234 }
0x1891   :  { %2319 = vrot.lane.b32.xlu0 %v3235_v26, %s3293_s0 }
0x1903   :  { %v2320_v27 = vpop.permute.xlu0 %2319 }
0x1904   :  { %v2322_v17 = vmul.f32 %v3233_v20, %v2320_v27 }
0x1906   :  { %2328 = vrot.lane.b32.xlu1 %v2322_v17, %s3294_s1 }
0x1978   :  { %v2329_v59 = vpop.permute.xlu1 %2328 }
0x1979   :  { %2912 = vmatmul.mubr.msk.f32.vlgmr.msra.gmra.mrb[22].mxu0 %vm157_vm3, %v2329_v59 }
0x1a4c   :  { %v2398_v61 = vpop.f32.mrb[22].mxu0 }
0x1a4d   :  { %v2399_v30 = vadd.f32 %v2398_v61, %v2326_v29  ;;  %v2913_v13 = vpop.f32.mrb[23].mxu0 }
0x1a4f   :  { %2402 = vst [vmem:[#allocation6] sm:$0x3] %v2399_v30 }
0x1a50   :  { %3270 = shalt.err (!%p3267_p12)
}
0x1a51   :  { %s3271_s4 = scalar_lea.hbm %s3660_s2, 32 }
0x1a52   :  { %p3272_p13 = scmp.ne.s32.totalorder %s3660_s2, %s3271_s4  ;;  %p3275_p0 = scmp.lt.u32.totalorder %s3271_s4, %s3660_s2 }
0x1a54   :  { %p3277_p1 = pnand %p3275_p0, %p3272_p13 }
0x1a56   :  { %3280 = shalt.err (!%p3277_p1)
}
0x1a57   :  { %2412 = dma.vmem_to_hbm [thread:$0]  %s2410_s28, 32, %s3660_s2, [#allocation5]  }
0x1a58   :  { %3283 = dma.done.wait [#allocation5], 32  }
0x1a59   :  { %3284 = vsyncadd [#allocation5], 4294967264 }
0x1a5a   :  { %2416 = vsyncpa [#allocation4], 1 }
0x1a5b   :  { %2417 = vsyncpa [#allocation5], 1 }

</bundles_post_ra>
